<compile_context>
chip_gen: v5e
topology: v5e:2x2
jax: 0.10.0
libtpu: 0.0.40
codegen_flags: <defaults>
</compile_context>

<pallas_src>
import jax
import jax.numpy as jnp
from jax.experimental import pallas as pl
from jax.experimental.pallas import tpu as pltpu

_EPS = 1e-5
_VMEM_FLOOR = 32 * 1024 * 1024
_VMEM_CEIL = 48 * 1024 * 1024


def _compiler_params(est_block_bytes):
    vmem = int(min(max(4 * est_block_bytes, _VMEM_FLOOR), _VMEM_CEIL))
    return pltpu.CompilerParams(
        dimension_semantics=("parallel",),
        vmem_limit_bytes=vmem,
    )


# ----------------------------- kernel helpers ------------------------------
def _pad_hw(x, H, W, C):
    """Zero-pad an (H, W, C) tile by 1 pixel per spatial side, in registers."""
    zcol = jnp.zeros((H, 1, C), jnp.float32)
    zrow = jnp.zeros((1, W + 2, C), jnp.float32)
    xw = jnp.concatenate([zcol, x, zcol], axis=1)        # (H, W+2, C)
    return jnp.concatenate([zrow, xw, zrow], axis=0)     # (H+2, W+2, C)


def _im2col(xpad, H, W, C):
    """(H+2, W+2, C) -> (H*W, 9*C); tap order matches w.reshape(9*C, Cout)."""
    cols = [xpad[ky:ky + H, kx:kx + W, :].reshape(H * W, C)
            for ky in range(3) for kx in range(3)]
    return jnp.concatenate(cols, axis=-1)


def _stats2(z):
    """Per-channel (sum, sum_sq) of a (P, C) tile -> (2, C)."""
    return jnp.concatenate(
        [jnp.sum(z, axis=0, keepdims=True),
         jnp.sum(z * z, axis=0, keepdims=True)], axis=0)


# ------------------------------- kernels -----------------------------------
def _make_conv1_kernel(H, W, Cin, Cout, has_down):
    def kernel(*refs):
        if has_down:
            x_ref, w1_ref, b1_ref, wd_ref, bd_ref, z1_ref, s1_ref, sd_ref = refs
        else:
            x_ref, w1_ref, b1_ref, z1_ref, s1_ref = refs

        x_tok = x_ref[0]                                          # (P, Cin)
        x_img = x_tok.reshape(H, W, Cin)
        patches = _im2col(_pad_hw(x_img, H, W, Cin), H, W, Cin)   # (P, 9Cin)
        z1 = jnp.dot(patches, w1_ref[...],
                     preferred_element_type=jnp.float32) + b1_ref[...]
        z1_ref[0] = z1                                            # (P, Cout)
        s1_ref[0] = _stats2(z1)

        if has_down:
            zd = jnp.dot(x_tok, wd_ref[...],
                         preferred_element_type=jnp.float32) + bd_ref[...]
            sd_ref[0] = _stats2(zd)

    return kernel


def _make_conv2_kernel(H, W, Cout):
    def kernel(z1_ref, aff1_ref, w2_ref, b2_ref, z2_ref, s2_ref):
        aff = aff1_ref[...]                                       # (2, Cout)
        # BN1 folded affine + ReLU, one FMA sweep per element.
        y1 = jnp.maximum(z1_ref[0] * aff[0:1, :] + aff[1:2, :], 0.0)
        patches = _im2col(_pad_hw(y1.reshape(H, W, Cout), H, W, Cout),
                          H, W, Cout)                             # (P, 9Cout)
        z2 = jnp.dot(patches, w2_ref[...],
                     preferred_element_type=jnp.float32) + b2_ref[...]
        z2_ref[0] = z2
        s2_ref[0] = _stats2(z2)

    return kernel


def _make_fuse_kernel(Cin, Cout, has_down):
    def kernel(*refs):
        if has_down:
            x_ref, z2_ref, aff2_ref, wd_ref, bd_ref, affd_ref, out_ref = refs
        else:
            x_ref, z2_ref, aff2_ref, out_ref = refs

        aff2 = aff2_ref[...]
        y2 = z2_ref[0] * aff2[0:1, :] + aff2[1:2, :]
        if has_down:
            zd = jnp.dot(x_ref[0], wd_ref[...],
                         preferred_element_type=jnp.float32) + bd_ref[...]
            affd = affd_ref[...]
            r = zd * affd[0:1, :] + affd[1:2, :]
        else:
            r = x_ref[0]                                          # Cin == Cout
        out_ref[0] = jnp.maximum(r + y2, 0.0)

    return kernel


# ------------------------------ host wrapper --------------------------------
def _bn_affine(stats, gamma, beta, M):
    """Fold batch-stat BN into a packed (2, C) [scale; shift] pair."""
    s = jnp.sum(stats[:, 0, :], axis=0)
    ss = jnp.sum(stats[:, 1, :], axis=0)
    mean = s / M
    var = ss / M - mean * mean          # biased batch variance (training mode)
    scale = gamma.reshape(-1).astype(jnp.float32) * jax.lax.rsqrt(var + _EPS)
    shift = beta.reshape(-1).astype(jnp.float32) - mean * scale
    return jnp.stack([scale, shift], axis=0)


def residual_block(x, params, down_params=None):
    """x: (N, H, W, Cin) float32 NHWC. Returns (N, H, W, Cout) float32."""
    N, H, W, Cin = x.shape
    Cout = params["w1"].shape[-1]
    has_down = down_params is not None
    P = H * W
    M = N * P
    f32 = jnp.float32

    x_tok = x.astype(f32).reshape(N, P, Cin)          # contiguous, free
    # im2col-packed weights: (3,3,I,O) -> (9*I, O); tap order = (ky, kx, ci).
    w1 = params["w1"].astype(f32).reshape(9 * Cin, Cout)
    w2 = params["w2"].astype(f32).reshape(9 * Cout, Cout)
    row = lambda v: v.reshape(1, -1).astype(f32)
    b1, b2 = row(params["b1"]), row(params["b2"])
    if has_down:
        wd = down_params["wd"].astype(f32)            # (Cin, Cout)
        bd = row(down_params["bd"])

    # BlockSpec helpers (grid = (N,); one image slab per grid step).
    def tok_spec(C):
        return pl.BlockSpec((1, P, C), lambda n: (n, 0, 0))

    def full_spec(a):
        nd = a.ndim
        return pl.BlockSpec(a.shape, lambda n: (0,) * nd)

    def stat_spec():
        return pl.BlockSpec((1, 2, Cout), lambda n: (n, 0, 0))

    stat_shape = jax.ShapeDtypeStruct((N, 2, Cout), f32)
    act_shape = jax.ShapeDtypeStruct((N, P, Cout), f32)

    # ------------------------------ pass 1 ---------------------------------
    in1 = [x_tok, w1, b1]
    in1_specs = [tok_spec(Cin), full_spec(w1), full_spec(b1)]
    out1_shapes = [act_shape, stat_shape]
    out1_specs = [tok_spec(Cout), stat_spec()]
    if has_down:
        in1 += [wd, bd]
        in1_specs += [full_spec(wd), full_spec(bd)]
        out1_shapes.append(stat_shape)
        out1_specs.append(stat_spec())

    flops1 = 2 * M * 9 * Cin * Cout + (2 * M * Cin * Cout if has_down else 0)
    bytes1 = 4 * (M * Cin + M * Cout + 4 * N * Cout + w1.size + b1.size
                  + ((wd.size + bd.size) if has_down else 0))
    blk1 = 4 * (10 * P * Cin + P * Cout + w1.size
                + (wd.size if has_down else 0))

    res1 = pl.pallas_call(
        _make_conv1_kernel(H, W, Cin, Cout, has_down),
        grid=(N,),
        in_specs=in1_specs,
        out_specs=tuple(out1_specs),
        out_shape=tuple(out1_shapes),
        compiler_params=_compiler_params(blk1),
        cost_estimate=pl.CostEstimate(flops=flops1, transcendentals=0,
                                      bytes_accessed=bytes1),
    )(*in1)
    if has_down:
        z1, s1, sd = res1
    else:
        z1, s1 = res1

    # -------- per-channel BN1 (and BNd) fold: tiny, stays in plain JAX ------
    aff1 = _bn_affine(s1, params["g1"], params["be1"], M)
    if has_down:
        affd = _bn_affine(sd, down_params["gd"], down_params["bed"], M)

    # ------------------------------ pass 2 ---------------------------------
    flops2 = 2 * M * 9 * Cout * Cout + 3 * M * Cout
    bytes2 = 4 * (2 * M * Cout + 2 * N * Cout + w2.size + b2.size)
    blk2 = 4 * (12 * P * Cout + w2.size)

    z2, s2 = pl.pallas_call(
        _make_conv2_kernel(H, W, Cout),
        grid=(N,),
        in_specs=[tok_spec(Cout), full_spec(aff1),
                  full_spec(w2), full_spec(b2)],
        out_specs=(tok_spec(Cout), stat_spec()),
        out_shape=(act_shape, stat_shape),
        compiler_params=_compiler_params(blk2),
        cost_estimate=pl.CostEstimate(flops=flops2, transcendentals=0,
                                      bytes_accessed=bytes2),
    )(z1, aff1, w2, b2)

    aff2 = _bn_affine(s2, params["g2"], params["be2"], M)

    # ------------------------------ pass 3 ---------------------------------
    in3 = [x_tok, z2, aff2]
    in3_specs = [tok_spec(Cin), tok_spec(Cout), full_spec(aff2)]
    if has_down:
        in3 += [wd, bd, affd]
        in3_specs += [full_spec(wd), full_spec(bd), full_spec(affd)]

    flops3 = (2 * M * Cin * Cout if has_down else 0) + 5 * M * Cout
    bytes3 = 4 * (M * Cin + 2 * M * Cout
                  + ((wd.size + bd.size) if has_down else 0))
    blk3 = 4 * (P * Cin + 2 * P * Cout + (wd.size if has_down else 0))

    out = pl.pallas_call(
        _make_fuse_kernel(Cin, Cout, has_down),
        grid=(N,),
        in_specs=in3_specs,
        out_specs=tok_spec(Cout),
        out_shape=act_shape,
        compiler_params=_compiler_params(blk3),
        cost_estimate=pl.CostEstimate(flops=flops3, transcendentals=0,
                                      bytes_accessed=bytes3),
    )(*in3)
    return out.reshape(N, H, W, Cout)


# ---------------- pure-JAX reference for verification ----------------
def _ref_bn(y, g, b):
    mean = y.mean(axis=(0, 1, 2), keepdims=True)
    var = ((y - mean) ** 2).mean(axis=(0, 1, 2), keepdims=True)
    return (y - mean) * jax.lax.rsqrt(var + _EPS) * g.reshape(1, 1, 1, -1) \
        + b.reshape(1, 1, 1, -1)


def _ref_conv3x3(x, w, b):
    y = jax.lax.conv_general_dilated(
        x, w, window_strides=(1, 1), padding="SAME",
        dimension_numbers=("NHWC", "HWIO", "NHWC"))
    return y + b.reshape(1, 1, 1, -1)


def residual_block_ref(x, p, dp=None):
    y = jax.nn.relu(_ref_bn(_ref_conv3x3(x, p["w1"], p["b1"]), p["g1"], p["be1"]))
    y = _ref_bn(_ref_conv3x3(y, p["w2"], p["b2"]), p["g2"], p["be2"])
    if dp is not None:
        r = jnp.einsum("nhwc,co->nhwo", x, dp["wd"]) + dp["bd"].reshape(1, 1, 1, -1)
        r = _ref_bn(r, dp["gd"], dp["bed"])
    else:
        r = x
    return jax.nn.relu(r + y)


# ---------------- deterministic parameter construction ----------------
def _make_block_params(key, cin, cout):
    k1, k2, k3, k4 = jax.random.split(key, 4)
    return {
        "w1": 0.1 * jax.random.normal(k1, (3, 3, cin, cout), jnp.float32),
        "b1": 0.1 * jax.random.normal(k2, (cout,), jnp.float32),
        "g1": jnp.ones((cout,), jnp.float32),
        "be1": jnp.zeros((cout,), jnp.float32),
        "w2": 0.1 * jax.random.normal(k3, (3, 3, cout, cout), jnp.float32),
        "b2": 0.1 * jax.random.normal(k4, (cout,), jnp.float32),
        "g2": jnp.ones((cout,), jnp.float32),
        "be2": jnp.zeros((cout,), jnp.float32),
    }


def _make_downsample_params(key, cin, cout):
    k1, k2 = jax.random.split(key)
    return {
        "wd": 0.1 * jax.random.normal(k1, (cin, cout), jnp.float32),
        "bd": 0.1 * jax.random.normal(k2, (cout,), jnp.float32),
        "gd": jnp.ones((cout,), jnp.float32),
        "bed": jnp.zeros((cout,), jnp.float32),
    }


if __name__ == "__main__":
    key = jax.random.PRNGKey(0)
    kx, kp1, kp2, kpd = jax.random.split(key, 4)

    N, H, W, Cin = 2, 8, 8, 16
    x = jax.random.normal(kx, (N, H, W, Cin), jnp.float32)  # NHWC (== NCHW [2,16,8,8])

    block = jax.jit(residual_block)

    # Case 1: identity residual (Cin == Cout), like ResidualBlock(64, 64)
    p_id = _make_block_params(kp1, Cin, Cin)
    out_id = jax.block_until_ready(block(x, p_id))
    ref_id = residual_block_ref(x, p_id)
    assert out_id.shape == (N, H, W, Cin)
    assert jnp.allclose(out_id, ref_id, atol=1e-3, rtol=1e-3), "identity-path mismatch"

    # Case 2: downsample residual (channel expansion), like
    # ResidualBlock(64, 128, downsample=Conv2d(64,128,1)+BN)
    Cout = 32
    p_dn = _make_block_params(kp2, Cin, Cout)
    dp = _make_downsample_params(kpd, Cin, Cout)
    out_dn = jax.block_until_ready(block(x, p_dn, dp))
    ref_dn = residual_block_ref(x, p_dn, dp)
    assert out_dn.shape == (N, H, W, Cout)
    assert jnp.allclose(out_dn, ref_dn, atol=1e-3, rtol=1e-3), "downsample-path mismatch"

    print("KERNEL_OK")
</pallas_src>

<mosaic_0001>
module attributes {stable_mosaic.version = 11 : i64} {
  func.func @kernel(%arg0: i32, %arg1: memref<1x64x16xf32, #tpu.memory_space<vmem>>, %arg2: memref<144x16xf32, #tpu.memory_space<vmem>>, %arg3: memref<1x16xf32, #tpu.memory_space<vmem>>, %arg4: memref<1x64x16xf32, #tpu.memory_space<vmem>>, %arg5: memref<1x2x16xf32, #tpu.memory_space<vmem>>) attributes {dimension_semantics = [#tpu.dimension_semantics<parallel>], iteration_bounds = array<i64: 2>, scalar_prefetch = 0 : i64, scratch_operands = 0 : i64, tpu.core_type = #tpu.core_type<tc>, window_params = [{transform_indices = @transform_0, window_bounds = array<i64: 1, 64, 16>}, {pipeline_mode = #tpu.pipeline_mode<synchronous>, transform_indices = @transform_1, window_bounds = array<i64: 144, 16>}, {pipeline_mode = #tpu.pipeline_mode<synchronous>, transform_indices = @transform_2, window_bounds = array<i64: 1, 16>}, {transform_indices = @transform_3, window_bounds = array<i64: 1, 64, 16>}, {transform_indices = @transform_4, window_bounds = array<i64: 1, 2, 16>}]} {
    %c0 = arith.constant 0 : index
    %c0_0 = arith.constant 0 : index
    %c0_1 = arith.constant 0 : index
    %0 = vector.load %arg1[%c0, %c0_0, %c0_1] : memref<1x64x16xf32, #tpu.memory_space<vmem>>, vector<1x64x16xf32>
    %1 = vector.shape_cast %0 : vector<1x64x16xf32> to vector<64x16xf32>
    %2 = vector.shape_cast %1 : vector<64x16xf32> to vector<8x8x16xf32>
    %cst = arith.constant 0.000000e+00 : f32
    %3 = vector.broadcast %cst : f32 to vector<8x1x16xf32>
    %cst_2 = arith.constant 0.000000e+00 : f32
    %4 = vector.broadcast %cst_2 : f32 to vector<1x10x16xf32>
    %5 = tpu.concatenate %3, %2, %3 in 1 : vector<8x1x16xf32>, vector<8x8x16xf32>, vector<8x1x16xf32> -> vector<8x10x16xf32>
    %6 = tpu.concatenate %4, %5, %4 in 0 : vector<1x10x16xf32>, vector<8x10x16xf32>, vector<1x10x16xf32> -> vector<10x10x16xf32>
    %7 = vector.extract_strided_slice %6 {offsets = [0, 0, 0], sizes = [8, 8, 16], strides = [1, 1, 1]} : vector<10x10x16xf32> to vector<8x8x16xf32>
    %8 = vector.shape_cast %7 : vector<8x8x16xf32> to vector<64x16xf32>
    %9 = vector.extract_strided_slice %6 {offsets = [0, 1, 0], sizes = [8, 8, 16], strides = [1, 1, 1]} : vector<10x10x16xf32> to vector<8x8x16xf32>
    %10 = vector.shape_cast %9 : vector<8x8x16xf32> to vector<64x16xf32>
    %11 = vector.extract_strided_slice %6 {offsets = [0, 2, 0], sizes = [8, 8, 16], strides = [1, 1, 1]} : vector<10x10x16xf32> to vector<8x8x16xf32>
    %12 = vector.shape_cast %11 : vector<8x8x16xf32> to vector<64x16xf32>
    %13 = vector.extract_strided_slice %6 {offsets = [1, 0, 0], sizes = [8, 8, 16], strides = [1, 1, 1]} : vector<10x10x16xf32> to vector<8x8x16xf32>
    %14 = vector.shape_cast %13 : vector<8x8x16xf32> to vector<64x16xf32>
    %15 = vector.extract_strided_slice %6 {offsets = [1, 1, 0], sizes = [8, 8, 16], strides = [1, 1, 1]} : vector<10x10x16xf32> to vector<8x8x16xf32>
    %16 = vector.shape_cast %15 : vector<8x8x16xf32> to vector<64x16xf32>
    %17 = vector.extract_strided_slice %6 {offsets = [1, 2, 0], sizes = [8, 8, 16], strides = [1, 1, 1]} : vector<10x10x16xf32> to vector<8x8x16xf32>
    %18 = vector.shape_cast %17 : vector<8x8x16xf32> to vector<64x16xf32>
    %19 = vector.extract_strided_slice %6 {offsets = [2, 0, 0], sizes = [8, 8, 16], strides = [1, 1, 1]} : vector<10x10x16xf32> to vector<8x8x16xf32>
    %20 = vector.shape_cast %19 : vector<8x8x16xf32> to vector<64x16xf32>
    %21 = vector.extract_strided_slice %6 {offsets = [2, 1, 0], sizes = [8, 8, 16], strides = [1, 1, 1]} : vector<10x10x16xf32> to vector<8x8x16xf32>
    %22 = vector.shape_cast %21 : vector<8x8x16xf32> to vector<64x16xf32>
    %23 = vector.extract_strided_slice %6 {offsets = [2, 2, 0], sizes = [8, 8, 16], strides = [1, 1, 1]} : vector<10x10x16xf32> to vector<8x8x16xf32>
    %24 = vector.shape_cast %23 : vector<8x8x16xf32> to vector<64x16xf32>
    %25 = tpu.concatenate %8, %10, %12, %14, %16, %18, %20, %22, %24 in 1 : vector<64x16xf32>, vector<64x16xf32>, vector<64x16xf32>, vector<64x16xf32>, vector<64x16xf32>, vector<64x16xf32>, vector<64x16xf32>, vector<64x16xf32>, vector<64x16xf32> -> vector<64x144xf32>
    %c0_3 = arith.constant 0 : index
    %c0_4 = arith.constant 0 : index
    %26 = vector.load %arg2[%c0_3, %c0_4] : memref<144x16xf32, #tpu.memory_space<vmem>>, vector<144x16xf32>
    %cst_5 = arith.constant dense<0.000000e+00> : vector<64x16xf32>
    %27 = tpu.matmul %25, %26, %cst_5 {dimension_numbers = #tpu.dot_dimension_numbers<[1], [0], [0], [1], [0, 0, 1, 1], [], []>} : vector<64x144xf32>, vector<144x16xf32>, vector<64x16xf32> -> vector<64x16xf32>
    %c0_6 = arith.constant 0 : index
    %c0_7 = arith.constant 0 : index
    %28 = vector.load %arg3[%c0_6, %c0_7] : memref<1x16xf32, #tpu.memory_space<vmem>>, vector<1x16xf32>
    %29 = vector.broadcast %28 : vector<1x16xf32> to vector<64x16xf32>
    %30 = arith.addf %27, %29 : vector<64x16xf32>
    %c0_8 = arith.constant 0 : index
    %c0_9 = arith.constant 0 : index
    %c0_10 = arith.constant 0 : index
    %31 = vector.load %arg4[%c0_8, %c0_9, %c0_10] : memref<1x64x16xf32, #tpu.memory_space<vmem>>, vector<1x64x16xf32>
    %32 = vector.shape_cast %31 : vector<1x64x16xf32> to vector<64x16xf32>
    %33 = vector.shape_cast %30 : vector<64x16xf32> to vector<1x64x16xf32>
    tpu.vector_store %arg4[%c0_8, %c0_9, %c0_10], %33 {strides = array<i32>} : memref<1x64x16xf32, #tpu.memory_space<vmem>>, vector<1x64x16xf32>,
    %cst_11 = arith.constant dense<0.000000e+00> : vector<16xf32>
    %34 = vector.multi_reduction <add>, %30, %cst_11 [0] : vector<64x16xf32> to vector<16xf32>
    %35 = vector.shape_cast %34 : vector<16xf32> to vector<1x16xf32>
    %36 = arith.mulf %30, %30 : vector<64x16xf32>
    %cst_12 = arith.constant dense<0.000000e+00> : vector<16xf32>
    %37 = vector.multi_reduction <add>, %36, %cst_12 [0] : vector<64x16xf32> to vector<16xf32>
    %38 = vector.shape_cast %37 : vector<16xf32> to vector<1x16xf32>
    %39 = tpu.concatenate %35, %38 in 0 : vector<1x16xf32>, vector<1x16xf32> -> vector<2x16xf32>
    %c0_13 = arith.constant 0 : index
    %c0_14 = arith.constant 0 : index
    %c0_15 = arith.constant 0 : index
    %40 = vector.load %arg5[%c0_13, %c0_14, %c0_15] : memref<1x2x16xf32, #tpu.memory_space<vmem>>, vector<1x2x16xf32>
    %41 = vector.shape_cast %40 : vector<1x2x16xf32> to vector<2x16xf32>
    %42 = vector.shape_cast %39 : vector<2x16xf32> to vector<1x2x16xf32>
    tpu.vector_store %arg5[%c0_13, %c0_14, %c0_15], %42 {strides = array<i32>} : memref<1x2x16xf32, #tpu.memory_space<vmem>>, vector<1x2x16xf32>,
    return
  }
  func.func @transform_0(%arg0: i32) -> (i32, i32, i32) {
    %c0_i32 = arith.constant 0 : i32
    %c0_i32_0 = arith.constant 0 : i32
    %c0_i32_1 = arith.constant 0 : i32
    return %arg0, %c0_i32, %c0_i32_0 : i32, i32, i32
  }
  func.func @transform_1(%arg0: i32) -> (i32, i32) {
    %c0_i32 = arith.constant 0 : i32
    %c0_i32_0 = arith.constant 0 : i32
    %c0_i32_1 = arith.constant 0 : i32
    return %c0_i32, %c0_i32_0 : i32, i32
  }
  func.func @transform_2(%arg0: i32) -> (i32, i32) {
    %c0_i32 = arith.constant 0 : i32
    %c0_i32_0 = arith.constant 0 : i32
    %c0_i32_1 = arith.constant 0 : i32
    return %c0_i32, %c0_i32_0 : i32, i32
  }
  func.func @transform_3(%arg0: i32) -> (i32, i32, i32) {
    %c0_i32 = arith.constant 0 : i32
    %c0_i32_0 = arith.constant 0 : i32
    %c0_i32_1 = arith.constant 0 : i32
    return %arg0, %c0_i32, %c0_i32_0 : i32, i32, i32
  }
  func.func @transform_4(%arg0: i32) -> (i32, i32, i32) {
    %c0_i32 = arith.constant 0 : i32
    %c0_i32_0 = arith.constant 0 : i32
    %c0_i32_1 = arith.constant 0 : i32
    return %arg0, %c0_i32, %c0_i32_0 : i32, i32, i32
  }
}

module attributes {stable_mosaic.version = 11 : i64} {
  func.func @kernel(%arg0: i32, %arg1: memref<1x64x16xf32, #tpu.memory_space<vmem>>, %arg2: memref<2x16xf32, #tpu.memory_space<vmem>>, %arg3: memref<144x16xf32, #tpu.memory_space<vmem>>, %arg4: memref<1x16xf32, #tpu.memory_space<vmem>>, %arg5: memref<1x64x16xf32, #tpu.memory_space<vmem>>, %arg6: memref<1x2x16xf32, #tpu.memory_space<vmem>>) attributes {dimension_semantics = [#tpu.dimension_semantics<parallel>], iteration_bounds = array<i64: 2>, scalar_prefetch = 0 : i64, scratch_operands = 0 : i64, tpu.core_type = #tpu.core_type<tc>, window_params = [{transform_indices = @transform_0, window_bounds = array<i64: 1, 64, 16>}, {pipeline_mode = #tpu.pipeline_mode<synchronous>, transform_indices = @transform_1, window_bounds = array<i64: 2, 16>}, {pipeline_mode = #tpu.pipeline_mode<synchronous>, transform_indices = @transform_2, window_bounds = array<i64: 144, 16>}, {pipeline_mode = #tpu.pipeline_mode<synchronous>, transform_indices = @transform_3, window_bounds = array<i64: 1, 16>}, {transform_indices = @transform_4, window_bounds = array<i64: 1, 64, 16>}, {transform_indices = @transform_5, window_bounds = array<i64: 1, 2, 16>}]} {
    %c0 = arith.constant 0 : index
    %c0_0 = arith.constant 0 : index
    %0 = vector.load %arg2[%c0, %c0_0] : memref<2x16xf32, #tpu.memory_space<vmem>>, vector<2x16xf32>
    %c0_1 = arith.constant 0 : index
    %c0_2 = arith.constant 0 : index
    %c0_3 = arith.constant 0 : index
    %1 = vector.load %arg1[%c0_1, %c0_2, %c0_3] : memref<1x64x16xf32, #tpu.memory_space<vmem>>, vector<1x64x16xf32>
    %2 = vector.shape_cast %1 : vector<1x64x16xf32> to vector<64x16xf32>
    %3 = vector.extract_strided_slice %0 {offsets = [0, 0], sizes = [1, 16], strides = [1, 1]} : vector<2x16xf32> to vector<1x16xf32>
    %4 = vector.broadcast %3 : vector<1x16xf32> to vector<64x16xf32>
    %5 = arith.mulf %2, %4 : vector<64x16xf32>
    %6 = vector.extract_strided_slice %0 {offsets = [1, 0], sizes = [1, 16], strides = [1, 1]} : vector<2x16xf32> to vector<1x16xf32>
    %7 = vector.broadcast %6 : vector<1x16xf32> to vector<64x16xf32>
    %8 = arith.addf %5, %7 : vector<64x16xf32>
    %cst = arith.constant 0.000000e+00 : f32
    %9 = vector.broadcast %cst : f32 to vector<64x16xf32>
    %10 = arith.maximumf %8, %9 : vector<64x16xf32>
    %11 = vector.shape_cast %10 : vector<64x16xf32> to vector<8x8x16xf32>
    %cst_4 = arith.constant 0.000000e+00 : f32
    %12 = vector.broadcast %cst_4 : f32 to vector<8x1x16xf32>
    %cst_5 = arith.constant 0.000000e+00 : f32
    %13 = vector.broadcast %cst_5 : f32 to vector<1x10x16xf32>
    %14 = tpu.concatenate %12, %11, %12 in 1 : vector<8x1x16xf32>, vector<8x8x16xf32>, vector<8x1x16xf32> -> vector<8x10x16xf32>
    %15 = tpu.concatenate %13, %14, %13 in 0 : vector<1x10x16xf32>, vector<8x10x16xf32>, vector<1x10x16xf32> -> vector<10x10x16xf32>
    %16 = vector.extract_strided_slice %15 {offsets = [0, 0, 0], sizes = [8, 8, 16], strides = [1, 1, 1]} : vector<10x10x16xf32> to vector<8x8x16xf32>
    %17 = vector.shape_cast %16 : vector<8x8x16xf32> to vector<64x16xf32>
    %18 = vector.extract_strided_slice %15 {offsets = [0, 1, 0], sizes = [8, 8, 16], strides = [1, 1, 1]} : vector<10x10x16xf32> to vector<8x8x16xf32>
    %19 = vector.shape_cast %18 : vector<8x8x16xf32> to vector<64x16xf32>
    %20 = vector.extract_strided_slice %15 {offsets = [0, 2, 0], sizes = [8, 8, 16], strides = [1, 1, 1]} : vector<10x10x16xf32> to vector<8x8x16xf32>
    %21 = vector.shape_cast %20 : vector<8x8x16xf32> to vector<64x16xf32>
    %22 = vector.extract_strided_slice %15 {offsets = [1, 0, 0], sizes = [8, 8, 16], strides = [1, 1, 1]} : vector<10x10x16xf32> to vector<8x8x16xf32>
    %23 = vector.shape_cast %22 : vector<8x8x16xf32> to vector<64x16xf32>
    %24 = vector.extract_strided_slice %15 {offsets = [1, 1, 0], sizes = [8, 8, 16], strides = [1, 1, 1]} : vector<10x10x16xf32> to vector<8x8x16xf32>
    %25 = vector.shape_cast %24 : vector<8x8x16xf32> to vector<64x16xf32>
    %26 = vector.extract_strided_slice %15 {offsets = [1, 2, 0], sizes = [8, 8, 16], strides = [1, 1, 1]} : vector<10x10x16xf32> to vector<8x8x16xf32>
    %27 = vector.shape_cast %26 : vector<8x8x16xf32> to vector<64x16xf32>
    %28 = vector.extract_strided_slice %15 {offsets = [2, 0, 0], sizes = [8, 8, 16], strides = [1, 1, 1]} : vector<10x10x16xf32> to vector<8x8x16xf32>
    %29 = vector.shape_cast %28 : vector<8x8x16xf32> to vector<64x16xf32>
    %30 = vector.extract_strided_slice %15 {offsets = [2, 1, 0], sizes = [8, 8, 16], strides = [1, 1, 1]} : vector<10x10x16xf32> to vector<8x8x16xf32>
    %31 = vector.shape_cast %30 : vector<8x8x16xf32> to vector<64x16xf32>
    %32 = vector.extract_strided_slice %15 {offsets = [2, 2, 0], sizes = [8, 8, 16], strides = [1, 1, 1]} : vector<10x10x16xf32> to vector<8x8x16xf32>
    %33 = vector.shape_cast %32 : vector<8x8x16xf32> to vector<64x16xf32>
    %34 = tpu.concatenate %17, %19, %21, %23, %25, %27, %29, %31, %33 in 1 : vector<64x16xf32>, vector<64x16xf32>, vector<64x16xf32>, vector<64x16xf32>, vector<64x16xf32>, vector<64x16xf32>, vector<64x16xf32>, vector<64x16xf32>, vector<64x16xf32> -> vector<64x144xf32>
    %c0_6 = arith.constant 0 : index
    %c0_7 = arith.constant 0 : index
    %35 = vector.load %arg3[%c0_6, %c0_7] : memref<144x16xf32, #tpu.memory_space<vmem>>, vector<144x16xf32>
    %cst_8 = arith.constant dense<0.000000e+00> : vector<64x16xf32>
    %36 = tpu.matmul %34, %35, %cst_8 {dimension_numbers = #tpu.dot_dimension_numbers<[1], [0], [0], [1], [0, 0, 1, 1], [], []>} : vector<64x144xf32>, vector<144x16xf32>, vector<64x16xf32> -> vector<64x16xf32>
    %c0_9 = arith.constant 0 : index
    %c0_10 = arith.constant 0 : index
    %37 = vector.load %arg4[%c0_9, %c0_10] : memref<1x16xf32, #tpu.memory_space<vmem>>, vector<1x16xf32>
    %38 = vector.broadcast %37 : vector<1x16xf32> to vector<64x16xf32>
    %39 = arith.addf %36, %38 : vector<64x16xf32>
    %c0_11 = arith.constant 0 : index
    %c0_12 = arith.constant 0 : index
    %c0_13 = arith.constant 0 : index
    %40 = vector.load %arg5[%c0_11, %c0_12, %c0_13] : memref<1x64x16xf32, #tpu.memory_space<vmem>>, vector<1x64x16xf32>
    %41 = vector.shape_cast %40 : vector<1x64x16xf32> to vector<64x16xf32>
    %42 = vector.shape_cast %39 : vector<64x16xf32> to vector<1x64x16xf32>
    tpu.vector_store %arg5[%c0_11, %c0_12, %c0_13], %42 {strides = array<i32>} : memref<1x64x16xf32, #tpu.memory_space<vmem>>, vector<1x64x16xf32>,
    %cst_14 = arith.constant dense<0.000000e+00> : vector<16xf32>
    %43 = vector.multi_reduction <add>, %39, %cst_14 [0] : vector<64x16xf32> to vector<16xf32>
    %44 = vector.shape_cast %43 : vector<16xf32> to vector<1x16xf32>
    %45 = arith.mulf %39, %39 : vector<64x16xf32>
    %cst_15 = arith.constant dense<0.000000e+00> : vector<16xf32>
    %46 = vector.multi_reduction <add>, %45, %cst_15 [0] : vector<64x16xf32> to vector<16xf32>
    %47 = vector.shape_cast %46 : vector<16xf32> to vector<1x16xf32>
    %48 = tpu.concatenate %44, %47 in 0 : vector<1x16xf32>, vector<1x16xf32> -> vector<2x16xf32>
    %c0_16 = arith.constant 0 : index
    %c0_17 = arith.constant 0 : index
    %c0_18 = arith.constant 0 : index
    %49 = vector.load %arg6[%c0_16, %c0_17, %c0_18] : memref<1x2x16xf32, #tpu.memory_space<vmem>>, vector<1x2x16xf32>
    %50 = vector.shape_cast %49 : vector<1x2x16xf32> to vector<2x16xf32>
    %51 = vector.shape_cast %48 : vector<2x16xf32> to vector<1x2x16xf32>
    tpu.vector_store %arg6[%c0_16, %c0_17, %c0_18], %51 {strides = array<i32>} : memref<1x2x16xf32, #tpu.memory_space<vmem>>, vector<1x2x16xf32>,
    return
  }
  func.func @transform_0(%arg0: i32) -> (i32, i32, i32) {
    %c0_i32 = arith.constant 0 : i32
    %c0_i32_0 = arith.constant 0 : i32
    %c0_i32_1 = arith.constant 0 : i32
    return %arg0, %c0_i32, %c0_i32_0 : i32, i32, i32
  }
  func.func @transform_1(%arg0: i32) -> (i32, i32) {
    %c0_i32 = arith.constant 0 : i32
    %c0_i32_0 = arith.constant 0 : i32
    %c0_i32_1 = arith.constant 0 : i32
    return %c0_i32, %c0_i32_0 : i32, i32
  }
  func.func @transform_2(%arg0: i32) -> (i32, i32) {
    %c0_i32 = arith.constant 0 : i32
    %c0_i32_0 = arith.constant 0 : i32
    %c0_i32_1 = arith.constant 0 : i32
    return %c0_i32, %c0_i32_0 : i32, i32
  }
  func.func @transform_3(%arg0: i32) -> (i32, i32) {
    %c0_i32 = arith.constant 0 : i32
    %c0_i32_0 = arith.constant 0 : i32
    %c0_i32_1 = arith.constant 0 : i32
    return %c0_i32, %c0_i32_0 : i32, i32
  }
  func.func @transform_4(%arg0: i32) -> (i32, i32, i32) {
    %c0_i32 = arith.constant 0 : i32
    %c0_i32_0 = arith.constant 0 : i32
    %c0_i32_1 = arith.constant 0 : i32
    return %arg0, %c0_i32, %c0_i32_0 : i32, i32, i32
  }
  func.func @transform_5(%arg0: i32) -> (i32, i32, i32) {
    %c0_i32 = arith.constant 0 : i32
    %c0_i32_0 = arith.constant 0 : i32
    %c0_i32_1 = arith.constant 0 : i32
    return %arg0, %c0_i32, %c0_i32_0 : i32, i32, i32
  }
}

module attributes {stable_mosaic.version = 11 : i64} {
  func.func @kernel(%arg0: i32, %arg1: memref<1x64x16xf32, #tpu.memory_space<vmem>>, %arg2: memref<1x64x16xf32, #tpu.memory_space<vmem>>, %arg3: memref<2x16xf32, #tpu.memory_space<vmem>>, %arg4: memref<1x64x16xf32, #tpu.memory_space<vmem>>) attributes {dimension_semantics = [#tpu.dimension_semantics<parallel>], iteration_bounds = array<i64: 2>, scalar_prefetch = 0 : i64, scratch_operands = 0 : i64, tpu.core_type = #tpu.core_type<tc>, window_params = [{transform_indices = @transform_0, window_bounds = array<i64: 1, 64, 16>}, {transform_indices = @transform_1, window_bounds = array<i64: 1, 64, 16>}, {pipeline_mode = #tpu.pipeline_mode<synchronous>, transform_indices = @transform_2, window_bounds = array<i64: 2, 16>}, {transform_indices = @transform_3, window_bounds = array<i64: 1, 64, 16>}]} {
    %c0 = arith.constant 0 : index
    %c0_0 = arith.constant 0 : index
    %0 = vector.load %arg3[%c0, %c0_0] : memref<2x16xf32, #tpu.memory_space<vmem>>, vector<2x16xf32>
    %c0_1 = arith.constant 0 : index
    %c0_2 = arith.constant 0 : index
    %c0_3 = arith.constant 0 : index
    %1 = vector.load %arg2[%c0_1, %c0_2, %c0_3] : memref<1x64x16xf32, #tpu.memory_space<vmem>>, vector<1x64x16xf32>
    %2 = vector.shape_cast %1 : vector<1x64x16xf32> to vector<64x16xf32>
    %3 = vector.extract_strided_slice %0 {offsets = [0, 0], sizes = [1, 16], strides = [1, 1]} : vector<2x16xf32> to vector<1x16xf32>
    %4 = vector.broadcast %3 : vector<1x16xf32> to vector<64x16xf32>
    %5 = arith.mulf %2, %4 : vector<64x16xf32>
    %6 = vector.extract_strided_slice %0 {offsets = [1, 0], sizes = [1, 16], strides = [1, 1]} : vector<2x16xf32> to vector<1x16xf32>
    %7 = vector.broadcast %6 : vector<1x16xf32> to vector<64x16xf32>
    %8 = arith.addf %5, %7 : vector<64x16xf32>
    %c0_4 = arith.constant 0 : index
    %c0_5 = arith.constant 0 : index
    %c0_6 = arith.constant 0 : index
    %9 = vector.load %arg1[%c0_4, %c0_5, %c0_6] : memref<1x64x16xf32, #tpu.memory_space<vmem>>, vector<1x64x16xf32>
    %10 = vector.shape_cast %9 : vector<1x64x16xf32> to vector<64x16xf32>
    %11 = arith.addf %10, %8 : vector<64x16xf32>
    %cst = arith.constant 0.000000e+00 : f32
    %12 = vector.broadcast %cst : f32 to vector<64x16xf32>
    %13 = arith.maximumf %11, %12 : vector<64x16xf32>
    %c0_7 = arith.constant 0 : index
    %c0_8 = arith.constant 0 : index
    %c0_9 = arith.constant 0 : index
    %14 = vector.load %arg4[%c0_7, %c0_8, %c0_9] : memref<1x64x16xf32, #tpu.memory_space<vmem>>, vector<1x64x16xf32>
    %15 = vector.shape_cast %14 : vector<1x64x16xf32> to vector<64x16xf32>
    %16 = vector.shape_cast %13 : vector<64x16xf32> to vector<1x64x16xf32>
    tpu.vector_store %arg4[%c0_7, %c0_8, %c0_9], %16 {strides = array<i32>} : memref<1x64x16xf32, #tpu.memory_space<vmem>>, vector<1x64x16xf32>,
    return
  }
  func.func @transform_0(%arg0: i32) -> (i32, i32, i32) {
    %c0_i32 = arith.constant 0 : i32
    %c0_i32_0 = arith.constant 0 : i32
    %c0_i32_1 = arith.constant 0 : i32
    return %arg0, %c0_i32, %c0_i32_0 : i32, i32, i32
  }
  func.func @transform_1(%arg0: i32) -> (i32, i32, i32) {
    %c0_i32 = arith.constant 0 : i32
    %c0_i32_0 = arith.constant 0 : i32
    %c0_i32_1 = arith.constant 0 : i32
    return %arg0, %c0_i32, %c0_i32_0 : i32, i32, i32
  }
  func.func @transform_2(%arg0: i32) -> (i32, i32) {
    %c0_i32 = arith.constant 0 : i32
    %c0_i32_0 = arith.constant 0 : i32
    %c0_i32_1 = arith.constant 0 : i32
    return %c0_i32, %c0_i32_0 : i32, i32
  }
  func.func @transform_3(%arg0: i32) -> (i32, i32, i32) {
    %c0_i32 = arith.constant 0 : i32
    %c0_i32_0 = arith.constant 0 : i32
    %c0_i32_1 = arith.constant 0 : i32
    return %arg0, %c0_i32, %c0_i32_0 : i32, i32, i32
  }
}

</mosaic_0001>

<bundles_post_ra>
// kernel: residual_block.5
= control target key start
LH: loop header
LB: loop body
LE: loop exit
PB: predicated region body
PF: predicated region fallthrough
CT: control target
= control target key end

     0   :  { %8 = vsyncpa [#allocation3], 0  ;;  %s599_s0 = inlined_call_operand.vmem [shape: f32[2,64,16], index: 0, kind: input, shape index: {}]   ;;  %s600_s1 = inlined_call_operand.vmem [shape: f32[2,64,16], index: 1, kind: input, shape index: {}]   ;;  %s601_s2 = inlined_call_operand.vmem [shape: f32[2,16], index: 2, kind: input, shape index: {}]   ;;  %s602_s3 = inlined_call_operand.hbm [shape: f32[2,64,16], index: 3, kind: output, shape index: {}]  }
   0x1   :  { %10 = vsyncpa [#allocation3 + $0x1], 0  ;;  %s483_s12 = smov 0   ;;  %s485_s13 = smov 0  }
   0x2   :  { %s487_s14 = smov 0   ;;  %s489_s15 = smov 0  }
   0x3 LB: > { %s504_s16 = sadd.s32 4294967295, %s459_s15   ;;  %s339_s17 = sadd.s32 4294967294, %s459_s15   ;;  %s459_s15 = sphi %s489_s15, %s608_s15   ;;  %s455_s14 = sphi %s487_s14, %s607_s14   ;;  %s451_s13 = sphi %s485_s13, %s606_s13   ;;  %s447_s12 = sphi %s483_s12, %s605_s12  }
   0x4   : > { %s508_s18 = sadd.s32 1, %s459_s15   ;;  %s96_s19 = sadd.s32 1, %s455_s14 }
   0x5   : > { %s93_s20 = ssub.s32 %s459_s15, %s508_s18  ;;  %p106_p0 = scmp.ne.s32.totalorder %s455_s14, %s451_s13 }
   0x6   : > { %p94_p1 = scmp.eq.s32.totalorder %s93_s20, 0  ;;  %p107_p2 = scmp.eq.s32.totalorder %s504_s16, 1 }
   0x7   : > { %p112_p3 = scmp.ne.s32.totalorder %s451_s13, %s447_s12  ;;  %p113_p4 = scmp.eq.s32.totalorder %s339_s17, 1 }
   0x8   : > { %s519_s21 = scalar_select %p94_p1, %s455_s14, %s96_s19  }
   0x9   : > { %p521_p5 = por %p107_p2, %p106_p0  ;;  %p525_p6 = por %p113_p4, %p112_p3 }
   0xa   : > { %p342_p7 = scmp.ge.s32.totalorder %s459_s15, 1  ;;  %p150_p8 = scmp.lt.s32.totalorder %s459_s15, 3 }
   0xc   : > { %p151_p9 = pnand %p342_p7, %p150_p8 }
   0xd   : > { %p179_p10 = scmp.lt.s32.totalorder (!%p151_p9), %s504_s16, 1  ;;  %s176_s7 = sand.u32 (!%p151_p9), 1, %s451_s13  }
   0xe   : > { %154 = sbr.rel (%p151_p9) target bundleno = 43 (0x2b), region = 32  ;;  %s549_s8 = sshll.u32 (!%p151_p9), %s176_s7, 6 }
   0xf   : > { %s355_s9 = sshll.u32 (!%p151_p9), %s504_s16, 6  ;;  %s250_s24 = scalar_lea.sflag (!%p151_p9), [#allocation3], %s176_s7 }
  0x10   : > { %s261_s17 = scalar_lea.hbm (!%p151_p9), %s602_s3, %s355_s9  ;;  %s417_s29 = scalar_lea.hbm (!%p151_p9), %s602_s3, 128 }
  0x11   : > { %s264_s20 = sshll.u32 (!%p151_p9), %s261_s17, 4  ;;  %s265_s20 = int_to_ptr.hbm [resolvable:$true] %s264_s20 }
  0x12   : > { %s411_s25 = sshra.s32 (!%p151_p9), %s265_s20, 4  ;;  %s412_s25 = int_to_ptr.hbm [resolvable:$true] %s411_s25 }
  0x13   : > { %v189_v0 = vld [vmem:[%s601_s2] sm:$0x3]  ;;  %s180_s26 = scalar_select %p179_p10, %s504_s16, 1  ;;  %vm240_vm0 = vcmask 130048  }
  0x14   : > { %v198_v1 = vperm.slane %v189_v0, 0  ;;  %v207_v2 = vperm.slane %v189_v0, 1  ;;  %s178_s16 = scalar_lea.vmem [#allocation2], %s549_s8  ;;  %p418_p0 = scmp.lt.s32.totalorder %s412_s25, %s602_s3 }
  0x15   : > { %s353_s27 = sshll.u32 %s180_s26, 6  ;;  %s262_s19 = sshll.u32 %s178_s16, 4  ;;  %s263_s19 = int_to_ptr.vmem [resolvable:$true] %s262_s19 }
  0x16   : > { %s539_s30 = scalar_lea.vmem %s599_s0, %s353_s27  ;;  %s188_s6 = scalar_lea.vmem %s600_s1, %s353_s27 }
  0x17   : > { %v190_v3 = vld [vmem:[%s188_s6] sm:$0xff]  ;;  %v191_v4 = vld [vmem:[%s188_s6 + $0x8] sm:$0xff]  ;;  %v192_v8 = vld [vmem:[%s188_s6 + $0x10] sm:$0xff]  ;;  %s413_s26 = scalar_lea.hbm %s412_s25, 64 }
  0x18   : > { %v199_v5 = vmul.f32 %v198_v1, %v190_v3  ;;  %v216_v6 = vld [vmem:[%s539_s30] sm:$0xff]  ;;  %v200_v7 = vmul.f32 %v198_v1, %v191_v4  ;;  %v217_v9 = vld [vmem:[%s539_s30 + $0x8] sm:$0xff]  ;;  %v201_v10 = vmul.f32 %v198_v1, %v192_v8  ;;  %v193_v11 = vld [vmem:[%s188_s6 + $0x18] sm:$0xff]  ;;  %p414_p11 = scmp.ne.s32.totalorder %s412_s25, %s413_s26  ;;  %p419_p1 = scmp.lt.s32.totalorder %s417_s29, %s413_s26 }
  0x19   : > { %v194_v12 = vld [vmem:[%s188_s6 + $0x20] sm:$0xff]  ;;  %v218_v15 = vld [vmem:[%s539_s30 + $0x10] sm:$0xff]  ;;  %v202_v16 = vmul.f32 %v198_v1, %v193_v11  ;;  %v219_v17 = vld [vmem:[%s539_s30 + $0x18] sm:$0xff] }
  0x1a   : > { %v208_v13 = vadd.f32 %v207_v2, %v199_v5  ;;  %v209_v14 = vadd.f32 %v207_v2, %v200_v7  ;;  %v203_v18 = vmul.f32 %v198_v1, %v194_v12  ;;  %v195_v19 = vld [vmem:[%s188_s6 + $0x28] sm:$0xff]  ;;  %v210_v20 = vadd.f32 %v207_v2, %v201_v10  ;;  %v220_v21 = vld [vmem:[%s539_s30 + $0x20] sm:$0xff]  ;;  %v196_v23 = vld [vmem:[%s188_s6 + $0x30] sm:$0xff]  ;;  %p415_p12 = pnand %p414_p11, %p521_p5  ;;  %p420_p2 = por %p419_p1, %p418_p0 }
  0x1b   : > { %v204_v22 = vmul.f32 %v198_v1, %v195_v19  ;;  %v197_v24 = vld [vmem:[%s188_s6 + $0x38] sm:$0xff]  ;;  %v211_v27 = vadd.f32 %v207_v2, %v202_v16  ;;  %v221_v29 = vld [vmem:[%s539_s30 + $0x28] sm:$0xff]  ;;  %v205_v32 = vmul.f32 %v198_v1, %v196_v23  ;;  %v222_v38 = vld [vmem:[%s539_s30 + $0x30] sm:$0xff] }
  0x1c   : > { %v224_v25 = vadd.f32 %v216_v6, %v208_v13  ;;  %v225_v26 = vadd.f32 %v217_v9, %v209_v14  ;;  %v212_v28 = vadd.f32 %v207_v2, %v203_v18  ;;  %v226_v30 = vadd.f32 %v218_v15, %v210_v20  ;;  %v223_v39 = vld [vmem:[%s539_s30 + $0x38] sm:$0xff]  ;;  %p416_p13 = pneg %p415_p12 }
  0x1d   : > { %v213_v31 = vadd.f32 %v207_v2, %v204_v22  ;;  %v206_v33 = vmul.f32 %v198_v1, %v197_v24  ;;  %v227_v36 = vadd.f32 %v219_v17, %v211_v27  ;;  %v214_v42 = vadd.f32 %v207_v2, %v205_v32 }
  0x1e   : > { %v232_v34 = vmax.f32 %v224_v25, 0.0  ;;  %v233_v35 = vmax.f32 %v225_v26, 0.0  ;;  %v228_v37 = vadd.f32 %v220_v21, %v212_v28  ;;  %v234_v40 = vmax.f32 %v226_v30, 0.0  ;;  %p421_p3 = pnand %p420_p2, %p416_p13 }
  0x1f   : > { %v229_v41 = vadd.f32 %v221_v29, %v213_v31  ;;  %v215_v43 = vadd.f32 %v207_v2, %v206_v33  ;;  %v235_v44 = vmax.f32 %v227_v36, 0.0  ;;  %v230_v47 = vadd.f32 %v222_v38, %v214_v42 }
  0x20   : > { %241 = vst.msk [vmem:[%s178_s16] sm:$0xff] %vm240_vm0, %v232_v34  ;;  %v236_v45 = vmax.f32 %v228_v37, 0.0 }
  0x21   : > { %242 = vst.msk [vmem:[%s178_s16 + $0x8] sm:$0xff] %vm240_vm0, %v233_v35  ;;  %v237_v46 = vmax.f32 %v229_v41, 0.0  ;;  %v231_v48 = vadd.f32 %v223_v39, %v215_v43  ;;  %v238_v49 = vmax.f32 %v230_v47, 0.0 }
  0x22   : > { %243 = vst.msk [vmem:[%s178_s16 + $0x10] sm:$0xff] %vm240_vm0, %v234_v40 }
  0x23   : > { %244 = vst.msk [vmem:[%s178_s16 + $0x18] sm:$0xff] %vm240_vm0, %v235_v44  ;;  %v239_v50 = vmax.f32 %v231_v48, 0.0 }
  0x24   : > { %245 = vst.msk [vmem:[%s178_s16 + $0x20] sm:$0xff] %vm240_vm0, %v236_v45 }
  0x25   : > { %246 = vst.msk [vmem:[%s178_s16 + $0x28] sm:$0xff] %vm240_vm0, %v237_v46 }
  0x26   : > { %247 = vst.msk [vmem:[%s178_s16 + $0x30] sm:$0xff] %vm240_vm0, %v238_v49 }
  0x27   : > { %248 = vst.msk [vmem:[%s178_s16 + $0x38] sm:$0xff] %vm240_vm0, %v239_v50 }
  0x28   : > { %424 = shalt.err (!%p421_p3)
}
  0x29   : > { %s461_s5 = smov 128   ;;  %s462_s6 = smov 8  }
  0x2a   : > { %356 = dma.vmem_to_hbm [thread:$0]  (%p521_p5), %s263_s19, 1024, %s265_s20, %s250_s24, %s461_s5, %s461_s5, %s462_s6  }
  0x2b PF: > { %p362_p4 = scmp.ge.s32.totalorder %s459_s15, 2  ;;  %s279_s7 = sand.u32 1, %s447_s12  }
  0x2c   : > { %s280_s8 = scalar_lea.sflag [#allocation3], %s279_s7 }
  0x2d   : > { %p359_p7 = pnand %p362_p4, %p525_p6 }
  0x2f   : > { %p360_p8 = pneg %p359_p7 }
  0x31   : > { %442 = dma.done.wait (%p360_p8), %s280_s8, 1024  }
  0x32   : > { %444 = vsyncadd (%p360_p8), %s280_s8, 4294966272  ;;  %p13_p9 = scmp.ge.s32.totalorder %s508_s18, 4   ;;  %s605_s12 = smov %s451_s13 }
  0x33   : > { %s606_s13 = smov %s455_s14  ;;  %s607_s14 = smov %s519_s21 }
  0x34   : > { %s608_s15 = smov %s508_s18  ;;  %15 = sbr.rel (!%p13_p9) target bundleno = 3 (0x3), region = 70 }
  0x39   :  { %286 = vsyncpa [#allocation3], 1 }
  0x3a   :  { %288 = vsyncpa [#allocation3 + $0x1], 1 }

// kernel: residual_block.3
= control target key start
LH: loop header
LB: loop body
LE: loop exit
PB: predicated region body
PF: predicated region fallthrough
CT: control target
= control target key end

     0   :  { %10 = vsyncpa [#allocation3], 0  ;;  %s1672_s0 = inlined_call_operand.hbm [shape: f32[2,64,16], index: 0, kind: input, shape index: {}]   ;;  %s1673_s1 = inlined_call_operand.hbm [shape: f32[144,16], index: 1, kind: input, shape index: {}]   ;;  %s1674_s2 = inlined_call_operand.vmem [shape: f32[1,16], index: 2, kind: input, shape index: {}]   ;;  %s1675_s3 = inlined_call_operand.vmem [shape: f32[2,64,16], index: 3, kind: output, shape index: {0}]   ;;  %s1676_s4 = inlined_call_operand.vmem [shape: f32[2,2,16], index: 4, kind: output, shape index: {1}]  }
   0x1   :  { %12 = vsyncpa [#allocation3 + $0x1], 0 }
   0x2   :  { %13 = vsyncpa [#allocation5], 0  ;;  %s1279_s15 = smov 0   ;;  %s1281_s16 = smov 0  }
   0x3   :  { %s1283_s17 = smov 0   ;;  %s1285_s18 = smov 0  }
   0x4 LB: > { %s1298_s19 = sadd.s32 4294967295, %s1241_s18   ;;  %p39_p0 = scmp.ne.s32.totalorder %s1233_s16, %s1229_s15  ;;  %s1241_s18 = sphi %s1285_s18, %s1683_s18   ;;  %s1237_s17 = sphi %s1283_s17, %s1682_s17   ;;  %s1233_s16 = sphi %s1281_s16, %s1681_s16   ;;  %s1229_s15 = sphi %s1279_s15, %s1680_s15  }
   0x5   : > { %p40_p1 = scmp.eq.s32.totalorder %s1298_s19, 0  ;;  %p889_p2 = scmp.ge.s32.totalorder %s1241_s18, 1 }
   0x6   : > { %p144_p3 = scmp.lt.s32.totalorder %s1241_s18, 3  ;;  %s155_s23 = sshll.u32 %s1673_s1, 4  ;;  %s156_s23 = int_to_ptr.hbm [resolvable:$true] %s155_s23 }
   0x7   : > { %p1306_p4 = por %p40_p1, %p39_p0  ;;  %s1243_s25 = smov [#allocation4]  }
   0x8   : > { %p1313_p5 = pnand %p889_p2, %p144_p3  ;;  %s157_s26 = sshll.u32 %s1243_s25, 4  ;;  %s158_s26 = int_to_ptr.vmem [resolvable:$true] %s157_s26 }
   0x9   : > { %s1322_s27 = sadd.s32 1, %s1241_s18   ;;  %s1244_s28 = smov 128  }
   0xa   : > { %p953_p6 = pneg %p1313_p5  ;;  %s1245_s29 = smov 8  }
   0xb   : > { %s23_s30 = ssub.s32 %s1241_s18, %s1322_s27  ;;  %s26_s5 = sadd.s32 1, %s1237_s17 }
   0xc   : > { %p954_p7 = pnand %p953_p6, %p40_p1  ;;  %p24_p8 = scmp.eq.s32.totalorder %s23_s30, 0 }
   0xd   : > { %p33_p9 = scmp.ne.s32.totalorder %s1237_s17, %s1233_s16  ;;  %p34_p10 = scmp.eq.s32.totalorder %s1241_s18, 0 }
   0xe   : > { %956 = dma.hbm_to_vmem [thread:$0]  (!%p954_p7), %s156_s23, 2304, %s158_s26, [#allocation5], %s1244_s28, %s1244_s28, %s1245_s29  }
   0xf   : > { %p962_p11 = scmp.lt.s32.totalorder %s1241_s18, 2  ;;  %p35_p12 = por %p34_p10, %p33_p9 }
  0x10   : > { %s1335_s6 = scalar_select %p24_p8, %s1237_s17, %s26_s5  }
  0x11   : > { %s174_s7 = sand.u32 1, %s1237_s17   ;;  %s911_s9 = sshll.u32 %s1241_s18, 6 }
  0x12   : > { %s892_s8 = sshll.u32 %s174_s7, 6  ;;  %s183_s12 = scalar_lea.hbm %s1672_s0, %s911_s9 }
  0x13   : > { %s178_s13 = scalar_lea.vmem [#allocation2], %s892_s8  ;;  %s184_s15 = sshll.u32 %s183_s12, 4  ;;  %s185_s15 = int_to_ptr.hbm [resolvable:$true] %s184_s15 }
  0x14   : > { %s186_s14 = sshll.u32 %s178_s13, 4  ;;  %p1342_p13 = pnand %p962_p11, %p35_p12  ;;  %s187_s14 = int_to_ptr.vmem [resolvable:$true] %s186_s14 }
  0x15   : > { %s175_s22 = scalar_lea.sflag [#allocation3], %s174_s7  ;;  %s1173_s23 = sshra.s32 %s185_s15, 4  ;;  %s1174_s23 = int_to_ptr.hbm [resolvable:$true] %s1173_s23 }
  0x16   : > { %s1175_s25 = scalar_lea.hbm %s1174_s23, 64  ;;  %p1177_p2 = pneg %p1342_p13 }
  0x17   : > { %p1176_p0 = scmp.ne.s32.totalorder %s1174_s23, %s1175_s25  ;;  %s1180_s30 = scalar_lea.hbm %s1672_s0, 128 }
  0x18   : > { %p1181_p7 = scmp.lt.s32.totalorder %s1174_s23, %s1672_s0  ;;  %p1182_p8 = scmp.lt.s32.totalorder %s1180_s30, %s1175_s25 }
  0x19   : > { %p1178_p3 = pnand %p1177_p2, %p1176_p0 }
  0x1a   : > { %p1183_p9 = por %p1182_p8, %p1181_p7 }
  0x1b   : > { %p1179_p6 = pneg %p1178_p3 }
  0x1d   : > { %p1184_p10 = pnand %p1183_p9, %p1179_p6 }
  0x1f   : > { %1187 = shalt.err (!%p1184_p10)
}
  0x20   : > { %960 = dma.hbm_to_vmem [thread:$0]  (!%p1342_p13), %s185_s15, 1024, %s187_s14, %s175_s22, %s1244_s28, %s1244_s28, %s1245_s29  }
  0x21   : > { %198 = sbr.rel (%p1313_p5) target bundleno = 398 (0x18e), region = 32  ;;  %s200_s7 = sand.u32 (!%p1313_p5), 1, %s1233_s16  }
  0x22   : > { %s896_s9 = sshll.u32 (!%p1313_p5), %s200_s7, 6  ;;  %s201_s10 = scalar_lea.sflag (!%p1313_p5), [#allocation3], %s200_s7 }
  0x23   : > { %s1362_s11 = scalar_lea.vmem (!%p1313_p5), [#allocation2], %s896_s9 }
  0x26   : > { %1220 = dma.done.wait (%p1306_p4), %s201_s10, 1024  }
  0x27   : > { %1222 = vsyncadd (%p1306_p4), %s201_s10, 4294966272 }
  0x28   : > { %1224 = dma.done.wait (%p40_p1), [#allocation5], 2304  }
  0x29   : > { %1226 = vsyncadd (%p40_p1), [#allocation5], 4294964992  ;;  %v248_v0 = vld [vmem:[%s1362_s11] sm:$0xff]  ;;  %vm280_vm0 = vcmask 1040384   ;;  %v251_v2 = vld [vmem:[%s1362_s11 + $0x18] sm:$0xff]  ;;  %vm312_vm1 = vcmask 1046528  }
  0x2a   : > { %v252_v1 = vld [vmem:[%s1362_s11 + $0x20] sm:$0xff]  ;;  %v264_v3 = vrot.slane %v248_v0, 7  ;;  %v267_v5 = vrot.slane %v251_v2, 7  ;;  %v249_v6 = vld [vmem:[%s1362_s11 + $0x8] sm:$0xff]  ;;  %v1246_v7 = vmov 0.0   ;;  %s1247_s20 = smov 48  }
  0x2b   : > { %v268_v4 = vrot.slane %v252_v1, 7  ;;  %v1376_v8 = vrot.slane %v1246_v7, 1  ;;  %v253_v9 = vld [vmem:[%s1362_s11 + $0x28] sm:$0xff]  ;;  %v265_v10 = vrot.slane %v249_v6, 7  ;;  %vm336_vm2 = vcmask 1045504   ;;  %s1248_s24 = smov 16  }
  0x2c   : > { %v1380_v11 = vsel %vm280_vm0, 0.0, %v264_v3  ;;  %v289_v13 = vsel %vm280_vm0, %v264_v3, 0.0  ;;  %v1387_v14 = vsel %vm280_vm0, 0.0, %v267_v5  ;;  %v292_v16 = vsel %vm280_vm0, %v267_v5, 0.0  ;;  %s1249_s28 = smov 96   ;;  %s1250_s29 = smov 64  }
  0x2d   : > { %v1383_v12 = vsel %vm280_vm0, 0.0, %v268_v4  ;;  %v324_v17 = vrot.slane %v1387_v14, 1  ;;  %v293_v18 = vsel %vm280_vm0, %v268_v4, 0.0  ;;  %v325_v19 = vrot.slane %v292_v16, 1  ;;  %v250_v48 = vld [vmem:[%s1362_s11 + $0x10] sm:$0xff]  ;;  %s1251_s12 = smov 32  }
  0x2e   : > { %v1007_v15 = vpack.i.bf16 %v1380_v11, %v1383_v12  ;;  %v315_v20 = vrot.slane %v1380_v11, 1  ;;  %v316_v21 = vrot.slane %v289_v13, 1  ;;  %v269_v22 = vrot.slane %v253_v9, 7  ;;  %v254_v49 = vld [vmem:[%s1362_s11 + $0x30] sm:$0xff]  ;;  %s1252_s13 = smov 80   ;;  %s1253_s14 = smov 112  }
  0x2f   : > { %v349_v23 = vrot.slane %v292_v16, 2  ;;  %v327_v24 = vrot.slane %v1383_v12, 1  ;;  %v328_v25 = vrot.slane %v293_v18, 1  ;;  %v348_v26 = vrot.slane %v1387_v14, 2  ;;  %p239_p1 = scmp.lt.s32.totalorder %s1298_s19, 1 }
  0x30   : > { %1008 = vrot.lane.b32.xlu1 %v1007_v15, %s1247_s20  ;;  %v1399_v27 = vsel %vm312_vm1, %v324_v17, %v325_v19  ;;  %v317_v28 = vsel %vm312_vm1, %v315_v20, %v316_v21  ;;  %v1407_v31 = vrot.slane %v1246_v7, 2  ;;  %v1415_v34 = vsel %vm280_vm0, 0.0, %v265_v10 }
  0x31   : > { %v1017_v29 = vpack.i.bf16 %v1376_v8, %v1399_v27  ;;  %v1405_v30 = vsel %vm312_vm1, %v327_v24, %v328_v25  ;;  %v1412_v33 = vsel %vm336_vm2, %v348_v26, %v349_v23  ;;  %v1418_v35 = vsel %vm280_vm0, 0.0, %v269_v22  ;;  %v255_v26 = vld [vmem:[%s1362_s11 + $0x38] sm:$0xff]  ;;  %s1685_s19 = smov (!%p239_p1, %s1298_s19), 1 }
  0x32   : > { %v1027_v32 = vpack.i.bf16 %v317_v28, %v1405_v30  ;;  %v290_v36 = vsel %vm280_vm0, %v265_v10, 0.0  ;;  %v294_v37 = vsel %vm280_vm0, %v269_v22, 0.0  ;;  %v1012_v38 = vpack.i.bf16 %v1415_v34, %v1418_v35  ;;  %s912_s22 = sshll.u32 %s1685_s19, 6  ;;  %s900_s26 = sshll.u32 %s1685_s19, 1 }
  0x33   : > { %1018 = vrot.lane.b32.xlu0 %v1017_v29, %s1248_s24  ;;  %v1022_v39 = vpack.i.bf16 %v1407_v31, %v1412_v33  ;;  %v318_v40 = vrot.slane %v1415_v34, 1  ;;  %v319_v41 = vrot.slane %v290_v36, 1  ;;  %v330_v42 = vrot.slane %v1418_v35, 1  ;;  %s1620_s18 = scalar_lea.vmem %s1675_s3, %s912_s22  ;;  %s247_s8 = scalar_lea.vmem %s1676_s4, %s900_s26 }
  0x34   : > { %1013 = vrot.lane.b32.xlu2 %v1012_v38, %s1249_s28  ;;  %v331_v43 = vrot.slane %v294_v37, 1  ;;  %v339_v44 = vrot.slane %v1380_v11, 2  ;;  %v340_v45 = vrot.slane %v289_v13, 2  ;;  %v351_v46 = vrot.slane %v1383_v12, 2 }
  0x35   : > { %v352_v47 = vrot.slane %v293_v18, 2  ;;  %v1441_v53 = vsel %vm312_vm1, %v318_v40, %v319_v41  ;;  %v266_v55 = vrot.slane %v250_v48, 7  ;;  %v270_v56 = vrot.slane %v254_v49, 7  ;;  %v1501_v40 = vld [vmem:[#allocation4 + $0x80] sm:$0xff] }
  0x36   : > { %v341_v50 = vsel %vm336_vm2, %v339_v44, %v340_v45  ;;  %v332_v54 = vsel %vm312_vm1, %v330_v42, %v331_v43  ;;  %v342_v62 = vrot.slane %v1415_v34, 2  ;;  %v343_v63 = vrot.slane %v290_v36, 2  ;;  %v613_v36 = vld [vmem:[#allocation4 + $0x70] sm:$0xff]  ;;  %v611_v42 = vld [vmem:[#allocation4 + $0x60] sm:$0xff]  ;;  %v610_v45 = vld [vmem:[#allocation4 + $0x58] sm:$0xff] }
  0x37   : > { %v1436_v51 = vsel %vm336_vm2, %v351_v46, %v352_v47  ;;  %v1037_v57 = vpack.i.bf16 %v1441_v53, %v332_v54  ;;  %v1448_v58 = vsel %vm280_vm0, 0.0, %v266_v55  ;;  %v1451_v59 = vsel %vm280_vm0, 0.0, %v270_v56 }
  0x38   : > { %1028 = vrot.lane.b32.xlu1 %v1027_v32, %s1250_s29  ;;  %v1032_v52 = vpack.i.bf16 %v341_v50, %v1436_v51  ;;  %v291_v60 = vsel %vm280_vm0, %v266_v55, 0.0  ;;  %v295_v61 = vsel %vm280_vm0, %v270_v56, 0.0  ;;  %v321_v0 = vrot.slane %v1448_v58, 1 }
  0x39   : > { %v322_v1 = vrot.slane %v291_v60, 1  ;;  %v333_v2 = vrot.slane %v1451_v59, 1  ;;  %v334_v3 = vrot.slane %v295_v61, 1  ;;  %v354_v4 = vrot.slane %v1418_v35, 2 }
  0x3a   : > { %v355_v5 = vrot.slane %v294_v37, 2  ;;  %v1463_v6 = vsel %vm336_vm2, %v342_v62, %v343_v63  ;;  %v1067_v16 = vpack.i.bf16 %v1448_v58, %v1451_v59  ;;  %v345_v17 = vrot.slane %v1448_v58, 2  ;;  %v607_v62 = vld [vmem:[#allocation4 + $0x40] sm:$0xff] }
  0x3b   : > { %1023 = vrot.lane.b32.xlu0 %v1022_v39, %s1251_s12  ;;  %v1466_v7 = vsel %vm312_vm1, %v321_v0, %v322_v1  ;;  %v335_v9 = vsel %vm312_vm1, %v333_v2, %v334_v3  ;;  %v346_v18 = vrot.slane %v291_v60, 2  ;;  %v1087_v20 = vpack.i.bf16 %v1451_v59, %v1387_v14  ;;  %v612_v39 = vld [vmem:[#allocation4 + $0x68] sm:$0xff]  ;;  %v603_v63 = vld [vmem:[#allocation4 + $0x20] sm:$0xff]  ;;  %v602_v0 = vld [vmem:[#allocation4 + $0x18] sm:$0xff] }
  0x3c   : > { %1033 = vrot.lane.b32.xlu2 %v1032_v52, %s1252_s13  ;;  %v1470_v10 = vsel %vm336_vm2, %v354_v4, %v355_v5  ;;  %v1072_v15 = vpack.i.bf16 %v1466_v7, %v335_v9  ;;  %v1077_v19 = vpack.i.bf16 %v332_v54, %v1466_v7  ;;  %v357_v22 = vrot.slane %v1451_v59, 2  ;;  %v601_v2 = vld [vmem:[#allocation4 + $0x10] sm:$0xff]  ;;  %v600_v3 = vld [vmem:[#allocation4 + $0x8] sm:$0xff]  ;;  %v599_v4 = vld [vmem:[#allocation4] sm:$0xff] }
  0x3d   : > { %v1062_v13 = vpack.i.bf16 %v1463_v6, %v1470_v10  ;;  %v347_v21 = vsel %vm336_vm2, %v345_v17, %v346_v18  ;;  %v358_v23 = vrot.slane %v295_v61, 2  ;;  %v1092_v28 = vpack.i.bf16 %v335_v9, %v1399_v27 }
  0x3e   : > { %v1082_v24 = vpack.i.bf16 %v1470_v10, %v347_v21  ;;  %v271_v37 = vrot.slane %v255_v26, 7  ;;  %vm536_vm3 = vcmask 130048   ;;  %v1097_v41 = vpack.i.bf16 %v335_v9, %v1441_v53 }
  0x3f   : > { %v1491_v25 = vsel %vm336_vm2, %v357_v22, %v358_v23  ;;  %v1137_v61 = vpack.i.bf16 0.0, %v1387_v14  ;;  %vm545_vm4 = vcmask 261120   ;;  %vm554_vm5 = vcmask 392192  }
  0x40   : > { %1043 = vrot.lane.b32.xlu1 %v1027_v32, %s1248_s24  ;;  %v1102_v29 = vpack.i.bf16 %v1491_v25, %v1412_v33  ;;  %v614_v32 = vld [vmem:[#allocation4 + $0x78] sm:$0xff]  ;;  %v288_v43 = vsel %vm280_vm0, 0.0, %v271_v37  ;;  %v296_v44 = vsel %vm280_vm0, %v271_v37, 0.0  ;;  %v1107_v46 = vpack.i.bf16 %v1491_v25, %v1463_v6 }
  0x41   : > { %637 = vmatpush.msra.mxu0 %v614_v32  ;;  %914 = vmatpush.msra.mxu3 %v614_v32  ;;  %v1117_v47 = vpack.i.bf16 %v288_v43, %v1448_v58  ;;  %v365_v48 = vrot.slane %v288_v43, 2  ;;  %v366_v49 = vrot.slane %v296_v44, 2  ;;  %v362_v50 = vrot.slane %v288_v43, 1 }
  0x42   : > { %913 = vmatpush.msra.mxu2 %v614_v32  ;;  %v1112_v53 = vpack.i.bf16 %v288_v43, %v1383_v12  ;;  %vm563_vm6 = vcmask 523264   ;;  %vm572_vm7 = vcmask 654336   ;;  %vm581_vm8 = vcmask 785408  }
  0x43   : > { %1038 = vrot.lane.b32.xlu0 %v1037_v57, %s1253_s14  ;;  %638 = vmatpush.msra.mxu0 %v613_v36  ;;  %v367_v54 = vsel %vm336_vm2, %v365_v48, %v366_v49  ;;  %vm590_vm9 = vcmask 916480   ;;  %vm778_vm10 = vcmask 123904  }
  0x44   : > { %1048 = vrot.lane.b32.xlu2 %v1032_v52, %s1251_s12  ;;  %916 = vmatpush.msra.mxu3 %v613_v36  ;;  %v363_v52 = vrot.slane %v296_v44, 1 }
  0x45   : > { %639 = vmatpush.msra.mxu0 %v612_v39  ;;  %915 = vmatpush.msra.mxu2 %v613_v36 }
  0x46   : > { %918 = vmatpush.msra.mxu3 %v612_v39  ;;  %v364_v55 = vsel %vm312_vm1, %v362_v50, %v363_v52 }
  0x47   : > { %640 = vmatpush.msra.mxu0 %v611_v42  ;;  %917 = vmatpush.msra.mxu2 %v612_v39  ;;  %v1122_v56 = vpack.i.bf16 %v364_v55, %v1405_v30  ;;  %v1127_v60 = vpack.i.bf16 %v364_v55, %v1466_v7  ;;  %v609_v30 = vld [vmem:[#allocation4 + $0x50] sm:$0xff] }
  0x48   : > { %1058 = vrot.lane.b32.xlu1 %v1037_v57, %s1250_s29  ;;  %920 = vmatpush.msra.mxu3 %v611_v42  ;;  %v1132_v57 = vpack.i.bf16 %v367_v54, %v347_v21 }
  0x49   : > { %641 = vmatpush.msra.mxu0 %v610_v45  ;;  %919 = vmatpush.msra.mxu2 %v611_v42 }
  0x4a   : > { %922 = vmatpush.msra.mxu3 %v610_v45 }
  0x4b   : > { %1053 = vrot.lane.b32.xlu0 %v1012_v38, %s1247_s20  ;;  %v1498_v38 = vld [vmem:[#allocation4 + $0x88] sm:$0xff]  ;;  %921 = vmatpush.msra.mxu2 %v610_v45 }
  0x4c   : > { %1063 = vrot.lane.b32.xlu2 %v1062_v13, %s1252_s13  ;;  %692 = vmatpush.msra.mxu1 %v1498_v38 }
  0x4d   : > { %642 = vmatpush.msra.mxu0 %v609_v30  ;;  %924 = vmatpush.msra.mxu3 %v609_v30 }
  0x4e   : > { %693 = vmatpush.msra.mxu1 %v1501_v40  ;;  %923 = vmatpush.msra.mxu2 %v609_v30 }
  0x4f   : > { %901 = vmatmul.msk.f32.vlgmr.msra.gmra.mxu1 %vm536_vm3, %v1463_v6 }
  0x50   : > { %1073 = vrot.lane.b32.xlu1 %v1072_v15, %s1253_s14 }
  0x53   : > { %1068 = vrot.lane.b32.xlu0 %v1067_v16, %s1249_s28 }
  0x54   : > { %1078 = vrot.lane.b32.xlu2 %v1077_v19, %s1248_s24 }
  0x57   : > { %902 = vmatmul.msk.f32.gmra.mxu1 %vm536_vm3, %v347_v21 }
  0x58   : > { %1088 = vrot.lane.b32.xlu1 %v1087_v20, %s1247_s20 }
  0x5b   : > { %1083 = vrot.lane.b32.xlu0 %v1082_v24, %s1251_s12 }
  0x5c   : > { %1093 = vrot.lane.b32.xlu2 %v1092_v28, %s1250_s29 }
  0x5f   : > { %903 = vmatmul.msk.f32.gmra.mxu1 %vm536_vm3, %v1412_v33  ;;  %v608_v33 = vld [vmem:[#allocation4 + $0x48] sm:$0xff] }
  0x60   : > { %1103 = vrot.lane.b32.xlu1 %v1102_v29, %s1252_s13  ;;  %643 = vmatpush.msra.mxu0 %v608_v33 }
  0x61   : > { %926 = vmatpush.msra.mxu3 %v608_v33  ;;  %925 = vmatpush.msra.mxu2 %v608_v33 }
  0x62   : > { %644 = vmatpush.msra.mxu0 %v607_v62 }
  0x63   : > { %1098 = vrot.lane.b32.xlu0 %v1097_v41, %s1248_s24  ;;  %928 = vmatpush.msra.mxu3 %v607_v62 }
  0x64   : > { %1108 = vrot.lane.b32.xlu2 %v1107_v46, %s1251_s12  ;;  %927 = vmatpush.msra.mxu2 %v607_v62 }
  0x67   : > { %904 = vmatmul.msk.f32.gmra.mxu1 %vm536_vm3, %v1436_v51  ;;  %v604_v51 = vld [vmem:[#allocation4 + $0x28] sm:$0xff] }
  0x68   : > { %1118 = vrot.lane.b32.xlu1 %v1117_v47, %s1247_s20 }
  0x6b   : > { %1113 = vrot.lane.b32.xlu0 %v1112_v53, %s1249_s28 }
  0x6c   : > { %1123 = vrot.lane.b32.xlu2 %v1122_v56, %s1253_s14 }
  0x6f   : > { %905 = vmatmul.msk.f32.gmra.mxu1 %vm536_vm3, %v1470_v10 }
  0x70   : > { %1133 = vrot.lane.b32.xlu1 %v1132_v57, %s1252_s13 }
  0x73   : > { %1128 = vrot.lane.b32.xlu0 %v1127_v60, %s1250_s29 }
  0x74   : > { %1138 = vrot.lane.b32.xlu2 %v1137_v61, %s1249_s28 }
  0x77   : > { %906 = vmatmul.msk.f32.gmra.mxu1 %vm536_vm3, %v1491_v25 }
  0x78   : > { %526 = vrot.lane.b32.xlu1 %v1376_v8, %s1253_s14  ;;  %v606_v8 = vld [vmem:[#allocation4 + $0x38] sm:$0xff] }
  0x79   : > { %645 = vmatpush.msra.mxu0 %v606_v8  ;;  %930 = vmatpush.msra.mxu3 %v606_v8 }
  0x7a   : > { %929 = vmatpush.msra.mxu2 %v606_v8 }
  0x7b   : > { %516 = vrot.lane.b32.xlu0 %v1399_v27, %s1253_s14  ;;  %v605_v27 = vld [vmem:[#allocation4 + $0x30] sm:$0xff] }
  0x7c   : > { %646 = vmatpush.msra.mxu0 %v605_v27  ;;  %932 = vmatpush.msra.mxu3 %v605_v27 }
  0x7d   : > { %931 = vmatpush.msra.mxu2 %v605_v27 }
  0x7e   : > { %647 = vmatpush.msra.mxu0 %v604_v51  ;;  %934 = vmatpush.msra.mxu3 %v604_v51 }
  0x7f   : > { %933 = vmatpush.msra.mxu2 %v604_v51  ;;  %907 = vmatmul.msk.f32.gmra.mxu1 %vm536_vm3, %v367_v54 }
  0x80   : > { %648 = vmatpush.msra.mxu0 %v603_v63  ;;  %936 = vmatpush.msra.mxu3 %v603_v63 }
  0x81   : > { %935 = vmatpush.msra.mxu2 %v603_v63 }
  0x82   : > { %649 = vmatpush.msra.mxu0 %v602_v0  ;;  %938 = vmatpush.msra.mxu3 %v602_v0 }
  0x83   : > { %937 = vmatpush.msra.mxu2 %v602_v0 }
  0x84   : > { %650 = vmatpush.msra.mxu0 %v601_v2  ;;  %940 = vmatpush.msra.mxu3 %v601_v2 }
  0x85   : > { %939 = vmatpush.msra.mxu2 %v601_v2 }
  0x86   : > { %651 = vmatpush.msra.mxu0 %v600_v3  ;;  %942 = vmatpush.msra.mxu3 %v600_v3 }
  0x87   : > { %941 = vmatpush.msra.mxu2 %v600_v3 }
  0x88   : > { %652 = vmatpush.msra.mxu0 %v599_v4  ;;  %944 = vmatpush.msra.mxu3 %v599_v4 }
  0x89   : > { %943 = vmatpush.msra.mxu2 %v599_v4 }
  0x8b   : > { %945 = vmatpush.msrb.mxu2 %v1498_v38 }
  0x8d   : > { %946 = vmatpush.msrb.mxu2 %v1501_v40 }
  0x8e   : > { %v1014_v1 = vpop.permute.xlu2 %1013 }
  0x8f   : > { %v1016_v42 = vunpack.i.h.bf16 %v1014_v1  ;;  %v1015_v43 = vunpack.i.l.bf16 %v1014_v1 }
  0x96   : > { %v1034_v5 = vpop.permute.xlu2 %1033 }
  0x97   : > { %v1036_v28 = vunpack.i.h.bf16 %v1034_v5  ;;  %v1035_v29 = vunpack.i.l.bf16 %v1034_v5 }
  0x9e   : > { %v1049_v9 = vpop.permute.xlu2 %1048 }
  0x9f   : > { %v1051_v56 = vunpack.i.h.bf16 %v1049_v9  ;;  %v1050_v57 = vunpack.i.l.bf16 %v1049_v9 }
  0xa2   : > { %v1009_v6 = vpop.permute.xlu1 %1008 }
  0xa3   : > { %v1011_v21 = vunpack.i.h.bf16 %v1009_v6  ;;  %v1010_v22 = vunpack.i.l.bf16 %v1009_v6 }
  0xa5   : > { %v1019_v7 = vpop.permute.xlu0 %1018 }
  0xa6   : > { %v1021_v13 = vunpack.i.h.bf16 %v1019_v7  ;;  %v1020_v15 = vunpack.i.l.bf16 %v1019_v7  ;;  %v1064_v32 = vpop.permute.xlu2 %1063 }
  0xa7   : > { %v1066_v3 = vunpack.i.h.bf16 %v1064_v32  ;;  %v1065_v4 = vunpack.i.l.bf16 %v1064_v32 }
  0xa8   : > { %v537_v23 = vsel %vm536_vm3, 0.0, %v1021_v13  ;;  %v541_v24 = vsel %vm536_vm3, %v1387_v14, %v1020_v15 }
  0xaa   : > { %v1029_v10 = vpop.permute.xlu1 %1028 }
  0xab   : > { %v1031_v17 = vunpack.i.h.bf16 %v1029_v10  ;;  %v1030_v18 = vunpack.i.l.bf16 %v1029_v10 }
  0xad   : > { %v1024_v16 = vpop.permute.xlu0 %1023 }
  0xae   : > { %v1026_v19 = vunpack.i.h.bf16 %v1024_v16  ;;  %v1025_v20 = vunpack.i.l.bf16 %v1024_v16  ;;  %v1079_v55 = vpop.permute.xlu2 %1078 }
  0xb0   : > { %v546_v25 = vsel %vm545_vm4, %v537_v23, %v1026_v19  ;;  %v550_v26 = vsel %vm545_vm4, %v541_v24, %v1025_v20 }
  0xb1   : > { %v555_v36 = vsel %vm554_vm5, %v546_v25, %v1011_v21  ;;  %v559_v37 = vsel %vm554_vm5, %v550_v26, %v1010_v22  ;;  %v1080_v25 = vunpack.i.l.bf16 %v1079_v55  ;;  %v1081_v26 = vunpack.i.h.bf16 %v1079_v55 }
  0xb2   : > { %v1044_v38 = vpop.permute.xlu1 %1043  ;;  %v564_v39 = vsel %vm563_vm6, %v555_v36, %v1031_v17  ;;  %v568_v40 = vsel %vm563_vm6, %v559_v37, %v1030_v18 }
  0xb3   : > { %v573_v41 = vsel %vm572_vm7, %v564_v39, %v1036_v28  ;;  %v577_v14 = vsel %vm572_vm7, %v568_v40, %v1035_v29  ;;  %v1046_v52 = vunpack.i.h.bf16 %v1044_v38  ;;  %v1045_v53 = vunpack.i.l.bf16 %v1044_v38 }
  0xb4   : > { %v582_v47 = vsel %vm581_vm8, %v573_v41, %v1016_v42  ;;  %v586_v48 = vsel %vm581_vm8, %v577_v14, %v1015_v43  ;;  %v540_v36 = vsel %vm536_vm3, %v1448_v58, %v1080_v25  ;;  %v543_v38 = vsel %vm536_vm3, %v1418_v35, %v1081_v26 }
  0xb5   : > { %v1039_v44 = vpop.permute.xlu0 %1038  ;;  %v538_v60 = vsel %vm536_vm3, %v1380_v11, %v1046_v52  ;;  %v542_v61 = vsel %vm536_vm3, %v1383_v12, %v1045_v53 }
  0xb6   : > { %v1041_v45 = vunpack.i.h.bf16 %v1039_v44  ;;  %v1040_v46 = vunpack.i.l.bf16 %v1039_v44  ;;  %v547_v8 = vsel %vm545_vm4, %v538_v60, %v1051_v56  ;;  %v551_v27 = vsel %vm545_vm4, %v542_v61, %v1050_v57  ;;  %v1094_v5 = vpop.permute.xlu2 %1093 }
  0xb7   : > { %v1095_v42 = vunpack.i.l.bf16 %v1094_v5  ;;  %v1096_v44 = vunpack.i.h.bf16 %v1094_v5 }
  0xb8   : > { %v591_v49 = vsel %vm590_vm9, %v582_v47, %v1041_v45  ;;  %v595_v50 = vsel %vm590_vm9, %v586_v48, %v1040_v46 }
  0xb9   : > { %653 = vmatmul.f32.vlgmr.msra.gmra.mxu0 %v591_v49  ;;  %665 = vmatmul.f32.vlgmr.msra.gmra.mxu3 %v595_v50 }
  0xba   : > { %v1059_v54 = vpop.permute.xlu1 %1058 }
  0xbb   : > { %v1061_v51 = vunpack.i.h.bf16 %v1059_v54  ;;  %v1060_v63 = vunpack.i.l.bf16 %v1059_v54 }
  0xbd   : > { %v1054_v30 = vpop.permute.xlu0 %1053 }
  0xbe   : > { %v1056_v33 = vunpack.i.h.bf16 %v1054_v30  ;;  %v1055_v62 = vunpack.i.l.bf16 %v1054_v30  ;;  %v1109_v23 = vpop.permute.xlu2 %1108 }
  0xc0   : > { %v556_v0 = vsel %vm554_vm5, %v547_v8, %v1056_v33  ;;  %v560_v1 = vsel %vm554_vm5, %v551_v27, %v1055_v62  ;;  %v1111_v33 = vunpack.i.h.bf16 %v1109_v23 }
  0xc1   : > { %v565_v11 = vsel %vm563_vm6, %v556_v0, %v1061_v51  ;;  %v569_v12 = vsel %vm563_vm6, %v560_v1, %v1060_v63  ;;  %v1110_v63 = vunpack.i.l.bf16 %v1109_v23 }
  0xc2   : > { %v1074_v2 = vpop.permute.xlu1 %1073  ;;  %v574_v15 = vsel %vm572_vm7, %v565_v11, %v1066_v3  ;;  %v578_v16 = vsel %vm572_vm7, %v569_v12, %v1065_v4 }
  0xc3   : > { %v1076_v6 = vunpack.i.h.bf16 %v1074_v2  ;;  %v1075_v7 = vunpack.i.l.bf16 %v1074_v2 }
  0xc5   : > { %v1069_v9 = vpop.permute.xlu0 %1068 }
  0xc6   : > { %v1071_v10 = vunpack.i.h.bf16 %v1069_v9  ;;  %v1070_v13 = vunpack.i.l.bf16 %v1069_v9  ;;  %v1124_v14 = vpop.permute.xlu2 %1123 }
  0xc7   : > { %v1126_v50 = vunpack.i.h.bf16 %v1124_v14  ;;  %v1125_v35 = vunpack.i.l.bf16 %v1124_v14 }
  0xc8   : > { %v583_v17 = vsel %vm581_vm8, %v574_v15, %v1071_v10  ;;  %v587_v18 = vsel %vm581_vm8, %v578_v16, %v1070_v13 }
  0xc9   : > { %v592_v20 = vsel %vm590_vm9, %v583_v17, %v1076_v6  ;;  %v596_v21 = vsel %vm590_vm9, %v587_v18, %v1075_v7 }
  0xca   : > { %v1089_v19 = vpop.permute.xlu1 %1088  ;;  %656 = vmatmul.f32.gmra.mxu0 %v592_v20  ;;  %668 = vmatmul.f32.gmra.mxu3 %v596_v21 }
  0xcb   : > { %v1090_v37 = vunpack.i.l.bf16 %v1089_v19  ;;  %v1091_v39 = vunpack.i.h.bf16 %v1089_v19 }
  0xcc   : > { %v695_v25 = vpop.f32.mrf.mxu1 }
  0xcd   : > { %v1084_v22 = vpop.permute.xlu0 %1083 }
  0xce   : > { %v1085_v28 = vunpack.i.l.bf16 %v1084_v22  ;;  %v1086_v29 = vunpack.i.h.bf16 %v1084_v22  ;;  %v1139_v0 = vpop.permute.xlu2 %1138 }
  0xcf   : > { %v1141_v5 = vunpack.i.h.bf16 %v1139_v0  ;;  %v1140_v16 = vunpack.i.l.bf16 %v1139_v0 }
  0xd0   : > { %v549_v40 = vsel %vm545_vm4, %v540_v36, %v1085_v28  ;;  %v552_v41 = vsel %vm545_vm4, %v543_v38, %v1086_v29 }
  0xd1   : > { %v558_v45 = vsel %vm554_vm5, %v549_v40, %v1090_v37  ;;  %v561_v46 = vsel %vm554_vm5, %v552_v41, %v1091_v39 }
  0xd2   : > { %v1104_v24 = vpop.permute.xlu1 %1103  ;;  %v567_v58 = vsel %vm563_vm6, %v558_v45, %v1095_v42  ;;  %v570_v52 = vsel %vm563_vm6, %v561_v46, %v1096_v44 }
  0xd3   : > { %v1106_v47 = vunpack.i.h.bf16 %v1104_v24  ;;  %v1105_v48 = vunpack.i.l.bf16 %v1104_v24 }
  0xd4   : > { %v698_v26 = vpop.f32.mrf.mxu1 }
  0xd5   : > { %v1099_v32 = vpop.permute.xlu0 %1098  ;;  %v576_v57 = vsel %vm572_vm7, %v567_v58, %v1105_v48  ;;  %v579_v60 = vsel %vm572_vm7, %v570_v52, %v1106_v47 }
  0xd6   : > { %v1101_v53 = vunpack.i.h.bf16 %v1099_v32  ;;  %v1100_v56 = vunpack.i.l.bf16 %v1099_v32 }
  0xd8   : > { %v544_v51 = vsel %vm536_vm3, %v1451_v59, %v1101_v53  ;;  %v539_v1 = vsel %vm536_vm3, %v1415_v34, %v1100_v56 }
  0xd9   : > { %v553_v4 = vsel %vm545_vm4, %v544_v51, %v1111_v33  ;;  %v548_v6 = vsel %vm545_vm4, %v539_v1, %v1110_v63 }
  0xda   : > { %v1119_v43 = vpop.permute.xlu1 %1118 }
  0xdb   : > { %v1121_v2 = vunpack.i.h.bf16 %v1119_v43  ;;  %v1120_v3 = vunpack.i.l.bf16 %v1119_v43 }
  0xdc   : > { %v701_v28 = vpop.f32.mrf.mxu1 }
  0xdd   : > { %v1114_v49 = vpop.permute.xlu0 %1113  ;;  %v562_v59 = vsel %vm554_vm5, %v553_v4, %v1121_v2  ;;  %v557_v13 = vsel %vm554_vm5, %v548_v6, %v1120_v3 }
  0xde   : > { %v1116_v54 = vunpack.i.h.bf16 %v1114_v49  ;;  %v1115_v55 = vunpack.i.l.bf16 %v1114_v49 }
  0xe0   : > { %v585_v61 = vsel %vm581_vm8, %v576_v57, %v1115_v55  ;;  %v588_v30 = vsel %vm581_vm8, %v579_v60, %v1116_v54 }
  0xe1   : > { %v594_v8 = vsel %vm590_vm9, %v585_v61, %v1125_v35  ;;  %v597_v27 = vsel %vm590_vm9, %v588_v30, %v1126_v50 }
  0xe2   : > { %v1134_v62 = vpop.permute.xlu1 %1133  ;;  %662 = vmatmul.f32.vlgmr.msra.gmra.mxu2 %v594_v8  ;;  %671 = vmatmul.f32.gmra.mxu3 %v597_v27 }
  0xe3   : > { %v1136_v11 = vunpack.i.h.bf16 %v1134_v62  ;;  %v1135_v7 = vunpack.i.l.bf16 %v1134_v62 }
  0xe4   : > { %v704_v29 = vpop.f32.mrf.mxu1 }
  0xe5   : > { %v1129_v12 = vpop.permute.xlu0 %1128 }
  0xe6   : > { %v1131_v9 = vunpack.i.h.bf16 %v1129_v12  ;;  %v1130_v10 = vunpack.i.l.bf16 %v1129_v12 }
  0xe8   : > { %v566_v15 = vsel %vm563_vm6, %v557_v13, %v1130_v10  ;;  %v571_v34 = vsel %vm563_vm6, %v562_v59, %v1131_v9 }
  0xe9   : > { %v580_v18 = vsel %vm572_vm7, %v571_v34, %v1136_v11  ;;  %v575_v20 = vsel %vm572_vm7, %v566_v15, %v1135_v7 }
  0xea   : > { %v527_v17 = vpop.permute.xlu1 %526  ;;  %v589_v19 = vsel %vm581_vm8, %v580_v18, %v1141_v5  ;;  %908 = vmatmul.msk.f32.vlgmr.msrb.gmra.mxu2 %vm536_vm3, %v1407_v31  ;;  %v584_v23 = vsel %vm581_vm8, %v575_v20, %v1140_v16  ;;  %v1142_v31 = vld [vmem:[%s1674_s2] ss:$0 sm:$0xff] }
  0xeb   : > { %v598_v21 = vsel %vm590_vm9, %v589_v19, %v527_v17 }
  0xec   : > { %674 = vmatmul.f32.gmra.mxu3 %v598_v21  ;;  %v707_v39 = vpop.f32.mrf.mxu1 }
  0xed   : > { %v517_v22 = vpop.permute.xlu0 %516 }
  0xee   : > { %v593_v24 = vsel %vm590_vm9, %v584_v23, %v517_v22 }
  0xef   : > { %659 = vmatmul.f32.gmra.mxu0 %v593_v24 }
  0xf4   : > { %v710_v45 = vpop.f32.mrf.mxu1 }
  0xfc   : > { %v713_v48 = vpop.f32.mrf.mxu1 }
 0x136   : > { %v654_v32 = vpop.f32.mrf.mxu0 }
 0x137   : > { %v655_v36 = vadd.f32 %v1142_v31, %v654_v32 }
 0x139   : > { %v696_v37 = vadd.f32 %v695_v25, %v655_v36 }
 0x13b   : > { %719 = vst.msk [vmem:[%s1620_s18] sm:$0xff] %vm536_vm3, %v696_v37  ;;  %v748_v56 = vmul.f32 %v696_v37, %v696_v37  ;;  %v727_v61 = vsel %vm536_vm3, %v696_v37, 0.0 }
 0x13c   : > { %v666_v38 = vpop.f32.mrf.mxu3 }
 0x13d   : > { %v667_v40 = vadd.f32 %v1142_v31, %v666_v38  ;;  %v756_v63 = vsel %vm536_vm3, %v748_v56, 0.0 }
 0x13f   : > { %v708_v41 = vadd.f32 %v707_v39, %v667_v40 }
 0x141   : > { %723 = vst.msk [vmem:[%s1620_s18 + $0x20] sm:$0xff] %vm536_vm3, %v708_v41  ;;  %v752_v12 = vmul.f32 %v708_v41, %v708_v41  ;;  %v734_v10 = vsel %vm536_vm3, %v708_v41, 0.0 }
 0x143   : > { %v763_v16 = vsel %vm536_vm3, %v752_v12, 0.0 }
 0x147   : > { %v657_v14 = vpop.f32.mrf.mxu0 }
 0x148   : > { %v658_v42 = vadd.f32 %v1142_v31, %v657_v14 }
 0x14a   : > { %v699_v43 = vadd.f32 %v698_v26, %v658_v42 }
 0x14c   : > { %720 = vst.msk [vmem:[%s1620_s18 + $0x8] sm:$0xff] %vm536_vm3, %v699_v43  ;;  %v749_v54 = vmul.f32 %v699_v43, %v699_v43  ;;  %v728_v57 = vsel %vm536_vm3, %v699_v43, 0.0 }
 0x14d   : > { %v669_v44 = vpop.f32.mrf.mxu3  ;;  %v729_v27 = vadd.f32 %v728_v57, %v727_v61 }
 0x14e   : > { %v670_v46 = vadd.f32 %v1142_v31, %v669_v44  ;;  %v757_v30 = vsel %vm536_vm3, %v749_v54, 0.0 }
 0x14f   : > { %v758_v3 = vadd.f32 %v757_v30, %v756_v63 }
 0x150   : > { %v711_v47 = vadd.f32 %v710_v45, %v670_v46 }
 0x152   : > { %724 = vst.msk [vmem:[%s1620_s18 + $0x28] sm:$0xff] %vm536_vm3, %v711_v47  ;;  %v753_v59 = vmul.f32 %v711_v47, %v711_v47  ;;  %v736_v17 = vsel %vm536_vm3, %v711_v47, 0.0 }
 0x154   : > { %v765_v21 = vsel %vm536_vm3, %v753_v59, 0.0 }
 0x165   : > { %v663_v58 = vpop.f32.mrf.mxu2  ;;  %v672_v49 = vpop.f32.mrf.mxu3 }
 0x166   : > { %v664_v50 = vadd.f32 %v1142_v31, %v663_v58  ;;  %v673_v35 = vadd.f32 %v1142_v31, %v672_v49 }
 0x168   : > { %v705_v52 = vadd.f32 %v704_v29, %v664_v50  ;;  %v714_v53 = vadd.f32 %v713_v48, %v673_v35 }
 0x16a   : > { %722 = vst.msk [vmem:[%s1620_s18 + $0x18] sm:$0xff] %vm536_vm3, %v705_v52  ;;  %v751_v0 = vmul.f32 %v705_v52, %v705_v52  ;;  %v732_v5 = vsel %vm536_vm3, %v705_v52, 0.0  ;;  %v754_v18 = vmul.f32 %v714_v53, %v714_v53  ;;  %v738_v22 = vsel %vm536_vm3, %v714_v53, 0.0 }
 0x16b   : > { %725 = vst.msk [vmem:[%s1620_s18 + $0x30] sm:$0xff] %vm536_vm3, %v714_v53 }
 0x16c   : > { %v660_v55 = vpop.f32.mrf.mxu0  ;;  %v761_v13 = vsel %vm536_vm3, %v751_v0, 0.0  ;;  %v767_v26 = vsel %vm536_vm3, %v754_v18, 0.0 }
 0x16d   : > { %v661_v60 = vadd.f32 %v1142_v31, %v660_v55  ;;  %v716_v8 = vpop.f32.mrf.mxu2 }
 0x16f   : > { %v702_v33 = vadd.f32 %v701_v28, %v661_v60  ;;  %v675_v62 = vpop.f32.mrf.mxu3 }
 0x170   : > { %v676_v51 = vadd.f32 %v1142_v31, %v675_v62 }
 0x171   : > { %721 = vst.msk [vmem:[%s1620_s18 + $0x10] sm:$0xff] %vm536_vm3, %v702_v33  ;;  %v730_v1 = vsel %vm536_vm3, %v702_v33, 0.0  ;;  %v750_v2 = vmul.f32 %v702_v33, %v702_v33 }
 0x172   : > { %v731_v4 = vadd.f32 %v730_v1, %v729_v27  ;;  %v717_v11 = vadd.f32 %v716_v8, %v676_v51 }
 0x173   : > { %v759_v6 = vsel %vm536_vm3, %v750_v2, 0.0 }
 0x174   : > { %v733_v7 = vadd.f32 %v732_v5, %v731_v4  ;;  %v760_v9 = vadd.f32 %v759_v6, %v758_v3  ;;  %726 = vst.msk [vmem:[%s1620_s18 + $0x38] sm:$0xff] %vm536_vm3, %v717_v11  ;;  %v755_v23 = vmul.f32 %v717_v11, %v717_v11  ;;  %v740_v28 = vsel %vm536_vm3, %v717_v11, 0.0 }
 0x176   : > { %v762_v15 = vadd.f32 %v761_v13, %v760_v9  ;;  %v735_v34 = vadd.f32 %v734_v10, %v733_v7  ;;  %v769_v32 = vsel %vm536_vm3, %v755_v23, 0.0 }
 0x178   : > { %v737_v19 = vadd.f32 %v736_v17, %v735_v34  ;;  %v764_v20 = vadd.f32 %v763_v16, %v762_v15 }
 0x17a   : > { %v739_v24 = vadd.f32 %v738_v22, %v737_v19  ;;  %v766_v25 = vadd.f32 %v765_v21, %v764_v20 }
 0x17c   : > { %v741_v29 = vadd.f32 %v740_v28, %v739_v24  ;;  %v768_v31 = vadd.f32 %v767_v26, %v766_v25 }
 0x17e   : > { %v742_v36 = vrot.slane %v741_v29, 4  ;;  %v770_v37 = vadd.f32 %v769_v32, %v768_v31 }
 0x180   : > { %v743_v38 = vadd.f32 %v742_v36, %v741_v29  ;;  %v771_v39 = vrot.slane %v770_v37, 4 }
 0x182   : > { %v744_v40 = vrot.slane %v743_v38, 2  ;;  %v772_v41 = vadd.f32 %v771_v39, %v770_v37 }
 0x184   : > { %v745_v14 = vadd.f32 %v744_v40, %v743_v38  ;;  %v773_v42 = vrot.slane %v772_v41, 2 }
 0x186   : > { %v746_v43 = vrot.slane %v745_v14, 1  ;;  %v774_v44 = vadd.f32 %v773_v42, %v772_v41 }
 0x188   : > { %v775_v45 = vrot.slane %v774_v44, 1  ;;  %v747_v46 = vadd.f32 %v746_v43, %v745_v14 }
 0x18a   : > { %v776_v47 = vadd.f32 %v775_v45, %v774_v44 }
 0x18c   : > { %v777_v48 = vsel %vm280_vm0, %v747_v46, %v776_v47 }
 0x18d   : > { %779 = vst.msk [vmem:[%s247_s8] sm:$0x3] %vm778_vm10, %v777_v48 }
 0x18e PF: > { %p16_p4 = scmp.ge.s32.totalorder %s1322_s27, 4   ;;  %s1680_s15 = smov %s1233_s16 }
 0x18f   : > { %s1681_s16 = smov %s1237_s17  ;;  %s1682_s17 = smov %s1335_s6 }
 0x190   : > { %s1683_s18 = smov %s1322_s27  ;;  %18 = sbr.rel (!%p16_p4) target bundleno = 4 (0x4), region = 88 }
 0x195   :  { %815 = vsyncpa [#allocation3], 1 }
 0x196   :  { %817 = vsyncpa [#allocation3 + $0x1], 1 }
 0x197   :  { %818 = vsyncpa [#allocation5], 1 }

// kernel: residual_block.4
= control target key start
LH: loop header
LB: loop body
LE: loop exit
PB: predicated region body
PF: predicated region fallthrough
CT: control target
= control target key end

     0   :  { %11 = vsyncpa [#allocation3], 0  ;;  %s1216_s18 = smov 0   ;;  %s1547_s0 = inlined_call_operand.vmem [shape: f32[2,64,16], index: 0, kind: input, shape index: {}]   ;;  %s1548_s1 = inlined_call_operand.vmem [shape: f32[2,16], index: 1, kind: input, shape index: {}]   ;;  %s1549_s2 = inlined_call_operand.hbm [shape: f32[144,16], index: 2, kind: input, shape index: {}]   ;;  %s1550_s3 = inlined_call_operand.vmem [shape: f32[1,16], index: 3, kind: input, shape index: {}]   ;;  %s1551_s4 = inlined_call_operand.vmem [shape: f32[2,64,16], index: 4, kind: output, shape index: {0}]   ;;  %s1552_s5 = inlined_call_operand.vmem [shape: f32[2,2,16], index: 5, kind: output, shape index: {1}]  }
   0x1 LB: > { %s177_s21 = sshll.u32 %s1549_s2, 4  ;;  %s910_s22 = sadd.s32 4294967295, %s1173_s18   ;;  %s1173_s18 = sphi %s1216_s18, %s17_s18   ;;  %s178_s21 = int_to_ptr.hbm [resolvable:$true] %s177_s21 }
   0x2   : > { %p912_p0 = scmp.ge.s32.totalorder %s1173_s18, 1  ;;  %p163_p1 = scmp.lt.s32.totalorder %s1173_s18, 3 }
   0x3   : > { %p976_p2 = scmp.eq.s32.totalorder %s910_s22, 0  ;;  %s1175_s23 = smov [#allocation2]  }
   0x4   : > { %p164_p3 = pnand %p912_p0, %p163_p1  ;;  %s179_s24 = sshll.u32 %s1175_s23, 4  ;;  %s180_s24 = int_to_ptr.vmem [resolvable:$true] %s179_s24 }
   0x5   : > { %s1176_s25 = smov 128   ;;  %s1177_s26 = smov 8  }
   0x6   : > { %p972_p4 = pneg %p164_p3  ;;  %206 = sbr.rel (%p164_p3) target bundleno = 379 (0x17b), region = 36 }
   0x8   : > { %p973_p5 = pnand %p976_p2, %p972_p4 }
   0xa   : > { %975 = dma.hbm_to_vmem [thread:$0]  (!%p973_p5), %s178_s21, 2304, %s180_s24, [#allocation3], %s1176_s25, %s1176_s25, %s1177_s26  }
   0xb   : > { %1168 = dma.done.wait (%p976_p2), [#allocation3], 2304  }
   0xc   : > { %1170 = vsyncadd (%p976_p2), [#allocation3], 4294964992  ;;  %p239_p6 = scmp.lt.s32.totalorder %s910_s22, 1  ;;  %v253_v0 = vld [vmem:[%s1548_s1] sm:$0x3]  ;;  %vm312_vm0 = vcmask 1040384  }
   0xd   : > { %v1242_v3 = vperm.slane %v253_v0, 0  ;;  %v1244_v4 = vperm.slane %v253_v0, 1  ;;  %vm344_vm1 = vcmask 1046528   ;;  %v1178_v26 = vmov 0.0   ;;  %s1179_s8 = smov 48   ;;  %s1180_s9 = smov 16  }
   0xe   : > { %s1554_s22 = smov (!%p239_p6, %s910_s22), 1  ;;  %v1259_v27 = vrot.slane %v1178_v26, 1  ;;  %vm368_vm2 = vcmask 1045504   ;;  %v1293_v53 = vrot.slane %v1178_v26, 2  ;;  %s1181_s10 = smov 96   ;;  %vm568_vm3 = vcmask 130048  }
   0xf   : > { %s932_s27 = sshll.u32 %s1554_s22, 6  ;;  %s1182_s11 = smov 64   ;;  %vm577_vm4 = vcmask 261120   ;;  %vm586_vm5 = vcmask 392192   ;;  %vm595_vm6 = vcmask 523264   ;;  %vm604_vm7 = vcmask 654336  }
  0x10   : > { %s1235_s30 = scalar_lea.vmem %s1547_s0, %s932_s27  ;;  %s1183_s12 = smov 32   ;;  %vm613_vm8 = vcmask 785408   ;;  %vm622_vm9 = vcmask 916480   ;;  %vm810_vm10 = vcmask 123904  }
  0x11   : > { %v254_v1 = vld [vmem:[%s1235_s30] sm:$0xff]  ;;  %v257_v5 = vld [vmem:[%s1235_s30 + $0x18] sm:$0xff]  ;;  %v255_v6 = vld [vmem:[%s1235_s30 + $0x8] sm:$0xff]  ;;  %s1184_s13 = smov 80   ;;  %s1185_s14 = smov 112  }
  0x12   : > { %v258_v2 = vld [vmem:[%s1235_s30 + $0x20] sm:$0xff]  ;;  %v259_v7 = vld [vmem:[%s1235_s30 + $0x28] sm:$0xff]  ;;  %v263_v8 = vmul.f32 %v1242_v3, %v254_v1  ;;  %v266_v10 = vmul.f32 %v1242_v3, %v257_v5  ;;  %v264_v11 = vmul.f32 %v1242_v3, %v255_v6  ;;  %v256_v41 = vld [vmem:[%s1235_s30 + $0x10] sm:$0xff]  ;;  %s1505_s20 = scalar_lea.vmem %s1551_s4, %s932_s27  ;;  %s921_s21 = sshll.u32 %s1554_s22, 1 }
  0x13   : > { %v267_v9 = vmul.f32 %v1242_v3, %v258_v2  ;;  %v268_v12 = vmul.f32 %v1242_v3, %v259_v7  ;;  %v260_v42 = vld [vmem:[%s1235_s30 + $0x30] sm:$0xff]  ;;  %v265_v51 = vmul.f32 %v1242_v3, %v256_v41  ;;  %s252_s25 = scalar_lea.vmem %s1552_s5, %s921_s21 }
  0x14   : > { %v272_v13 = vadd.f32 %v1244_v4, %v263_v8  ;;  %v275_v15 = vadd.f32 %v1244_v4, %v266_v10  ;;  %v273_v16 = vadd.f32 %v1244_v4, %v264_v11  ;;  %v269_v52 = vmul.f32 %v1242_v3, %v260_v42  ;;  %v261_v42 = vld [vmem:[%s1235_s30 + $0x38] sm:$0xff] }
  0x15   : > { %v276_v14 = vadd.f32 %v1244_v4, %v267_v9  ;;  %v277_v17 = vadd.f32 %v1244_v4, %v268_v12  ;;  %v274_v61 = vadd.f32 %v1244_v4, %v265_v51 }
  0x16   : > { %v280_v18 = vmax.f32 %v272_v13, 0.0  ;;  %v283_v20 = vmax.f32 %v275_v15, 0.0  ;;  %v281_v21 = vmax.f32 %v273_v16, 0.0  ;;  %v278_v62 = vadd.f32 %v1244_v4, %v269_v52 }
  0x17   : > { %v284_v19 = vmax.f32 %v276_v14, 0.0  ;;  %v285_v25 = vmax.f32 %v277_v17, 0.0  ;;  %v282_v10 = vmax.f32 %v274_v61, 0.0 }
  0x18   : > { %v296_v22 = vrot.slane %v280_v18, 7  ;;  %v299_v24 = vrot.slane %v283_v20, 7  ;;  %v297_v28 = vrot.slane %v281_v21, 7  ;;  %v286_v11 = vmax.f32 %v278_v62, 0.0 }
  0x19   : > { %v300_v23 = vrot.slane %v284_v19, 7  ;;  %v301_v40 = vrot.slane %v285_v25, 7  ;;  %v298_v17 = vrot.slane %v282_v10, 7  ;;  %v642_v10 = vld [vmem:[#allocation2 + $0x58] sm:$0xff] }
  0x1a   : > { %v1262_v29 = vsel %vm312_vm0, 0.0, %v296_v22  ;;  %v321_v31 = vsel %vm312_vm0, %v296_v22, 0.0  ;;  %v1269_v32 = vsel %vm312_vm0, 0.0, %v299_v24  ;;  %v324_v34 = vsel %vm312_vm0, %v299_v24, 0.0 }
  0x1b   : > { %v1265_v30 = vsel %vm312_vm0, 0.0, %v300_v23  ;;  %v356_v35 = vrot.slane %v1269_v32, 1  ;;  %v325_v36 = vsel %vm312_vm0, %v300_v23, 0.0  ;;  %v357_v37 = vrot.slane %v324_v34, 1 }
  0x1c   : > { %v997_v33 = vpack.i.bf16 %v1262_v29, %v1265_v30  ;;  %v347_v38 = vrot.slane %v1262_v29, 1  ;;  %v348_v39 = vrot.slane %v321_v31, 1  ;;  %v381_v43 = vrot.slane %v324_v34, 2 }
  0x1d   : > { %v359_v44 = vrot.slane %v1265_v30, 1  ;;  %v360_v45 = vrot.slane %v325_v36, 1  ;;  %v380_v46 = vrot.slane %v1269_v32, 2  ;;  %v1283_v47 = vsel %vm344_vm1, %v356_v35, %v357_v37 }
  0x1e   : > { %998 = vrot.lane.b32.xlu1 %v997_v33, %s1179_s8  ;;  %v349_v48 = vsel %vm344_vm1, %v347_v38, %v348_v39  ;;  %v1007_v49 = vpack.i.bf16 %v1259_v27, %v1283_v47  ;;  %v1301_v56 = vsel %vm312_vm0, 0.0, %v297_v28  ;;  %v1304_v57 = vsel %vm312_vm0, 0.0, %v301_v40 }
  0x1f   : > { %v1289_v50 = vsel %vm344_vm1, %v359_v44, %v360_v45  ;;  %v1298_v55 = vsel %vm368_vm2, %v380_v46, %v381_v43  ;;  %v322_v58 = vsel %vm312_vm0, %v297_v28, 0.0  ;;  %v1002_v59 = vpack.i.bf16 %v1301_v56, %v1304_v57 }
  0x20   : > { %1008 = vrot.lane.b32.xlu0 %v1007_v49, %s1180_s9  ;;  %v1017_v54 = vpack.i.bf16 %v349_v48, %v1289_v50  ;;  %v326_v60 = vsel %vm312_vm0, %v301_v40, 0.0  ;;  %v1012_v63 = vpack.i.bf16 %v1293_v53, %v1298_v55  ;;  %v350_v0 = vrot.slane %v1301_v56, 1 }
  0x21   : > { %1003 = vrot.lane.b32.xlu2 %v1002_v59, %s1181_s10  ;;  %v351_v1 = vrot.slane %v322_v58, 1  ;;  %v371_v2 = vrot.slane %v1262_v29, 2  ;;  %v372_v5 = vrot.slane %v321_v31, 2  ;;  %v362_v6 = vrot.slane %v1304_v57, 1 }
  0x22   : > { %v363_v7 = vrot.slane %v326_v60, 1  ;;  %v383_v8 = vrot.slane %v1265_v30, 2  ;;  %v384_v9 = vrot.slane %v325_v36, 2  ;;  %v302_v18 = vrot.slane %v286_v11, 7 }
  0x23   : > { %v373_v12 = vsel %vm368_vm2, %v371_v2, %v372_v5  ;;  %v1327_v15 = vsel %vm344_vm1, %v350_v0, %v351_v1  ;;  %v1334_v20 = vsel %vm312_vm0, 0.0, %v298_v17  ;;  %v323_v22 = vsel %vm312_vm0, %v298_v17, 0.0  ;;  %v645_v0 = vld [vmem:[#allocation2 + $0x70] sm:$0xff]  ;;  %v1386_v1 = vld [vmem:[#allocation2 + $0x88] sm:$0xff]  ;;  %v1389_v5 = vld [vmem:[#allocation2 + $0x80] sm:$0xff] }
  0x24   : > { %v1322_v13 = vsel %vm368_vm2, %v383_v8, %v384_v9  ;;  %v364_v16 = vsel %vm344_vm1, %v362_v6, %v363_v7  ;;  %v1337_v21 = vsel %vm312_vm0, 0.0, %v302_v18  ;;  %v327_v23 = vsel %vm312_vm0, %v302_v18, 0.0  ;;  %v644_v2 = vld [vmem:[#allocation2 + $0x68] sm:$0xff]  ;;  %724 = vmatpush.msra.mxu1 %v1386_v1  ;;  %v643_v7 = vld [vmem:[#allocation2 + $0x60] sm:$0xff] }
  0x25   : > { %v1022_v14 = vpack.i.bf16 %v373_v12, %v1322_v13  ;;  %v1027_v19 = vpack.i.bf16 %v1327_v15, %v364_v16  ;;  %v374_v24 = vrot.slane %v1301_v56, 2  ;;  %v375_v25 = vrot.slane %v322_v58, 2 }
  0x26   : > { %1018 = vrot.lane.b32.xlu1 %v1017_v54, %s1182_s11  ;;  %v353_v26 = vrot.slane %v1334_v20, 1  ;;  %v354_v28 = vrot.slane %v323_v22, 1  ;;  %v365_v31 = vrot.slane %v1337_v21, 1  ;;  %v366_v33 = vrot.slane %v327_v23, 1  ;;  %725 = vmatpush.msra.mxu1 %v1389_v5 }
  0x27   : > { %v386_v34 = vrot.slane %v1304_v57, 2  ;;  %v387_v35 = vrot.slane %v326_v60, 2  ;;  %v1349_v36 = vsel %vm368_vm2, %v374_v24, %v375_v25  ;;  %v1057_v43 = vpack.i.bf16 %v1334_v20, %v1337_v21 }
  0x28   : > { %1013 = vrot.lane.b32.xlu0 %v1012_v63, %s1183_s12  ;;  %v1352_v37 = vsel %vm344_vm1, %v353_v26, %v354_v28  ;;  %v367_v38 = vsel %vm344_vm1, %v365_v31, %v366_v33  ;;  %v377_v44 = vrot.slane %v1334_v20, 2  ;;  %v378_v45 = vrot.slane %v323_v22, 2  ;;  %v646_v63 = vld [vmem:[#allocation2 + $0x78] sm:$0xff]  ;;  %922 = vmatmul.msk.f32.vlgmr.msra.gmra.mxu1 %vm568_vm3, %v1349_v36  ;;  %v639_v28 = vld [vmem:[#allocation2 + $0x40] sm:$0xff] }
  0x29   : > { %1023 = vrot.lane.b32.xlu2 %v1022_v14, %s1184_s13  ;;  %v1356_v39 = vsel %vm368_vm2, %v386_v34, %v387_v35  ;;  %v1062_v41 = vpack.i.bf16 %v1352_v37, %v367_v38  ;;  %v270_v46 = vmul.f32 %v1242_v3, %v261_v42  ;;  %v1067_v48 = vpack.i.bf16 %v364_v16, %v1352_v37  ;;  %v635_v31 = vld [vmem:[#allocation2 + $0x20] sm:$0xff]  ;;  %v634_v33 = vld [vmem:[#allocation2 + $0x18] sm:$0xff]  ;;  %v633_v35 = vld [vmem:[#allocation2 + $0x10] sm:$0xff] }
  0x2a   : > { %v1052_v40 = vpack.i.bf16 %v1349_v36, %v1356_v39  ;;  %v1077_v49 = vpack.i.bf16 %v1337_v21, %v1269_v32  ;;  %v379_v51 = vsel %vm368_vm2, %v377_v44, %v378_v45  ;;  %v389_v52 = vrot.slane %v1337_v21, 2  ;;  %669 = vmatpush.msra.mxu0 %v646_v63  ;;  %935 = vmatpush.msra.mxu3 %v646_v63 }
  0x2b   : > { %v279_v58 = vadd.f32 %v1244_v4, %v270_v46  ;;  %v1072_v3 = vpack.i.bf16 %v1356_v39, %v379_v51  ;;  %v1082_v61 = vpack.i.bf16 %v367_v38, %v1283_v47  ;;  %934 = vmatpush.msra.mxu2 %v646_v63  ;;  %v1087_v6 = vpack.i.bf16 %v367_v38, %v1327_v15 }
  0x2c   : > { %670 = vmatpush.msra.mxu0 %v645_v0  ;;  %937 = vmatpush.msra.mxu3 %v645_v0  ;;  %v1127_v26 = vpack.i.bf16 0.0, %v1269_v32 }
  0x2d   : > { %v287_v60 = vmax.f32 %v279_v58, 0.0  ;;  %936 = vmatpush.msra.mxu2 %v645_v0 }
  0x2e   : > { %1038 = vrot.lane.b32.xlu1 %v1017_v54, %s1180_s9  ;;  %v390_v54 = vrot.slane %v327_v23, 2  ;;  %671 = vmatpush.msra.mxu0 %v644_v2 }
  0x2f   : > { %v303_v4 = vrot.slane %v287_v60, 7  ;;  %939 = vmatpush.msra.mxu3 %v644_v2  ;;  %938 = vmatpush.msra.mxu2 %v644_v2 }
  0x30   : > { %1028 = vrot.lane.b32.xlu0 %v1027_v19, %s1185_s14  ;;  %672 = vmatpush.msra.mxu0 %v643_v7 }
  0x31   : > { %1043 = vrot.lane.b32.xlu2 %v1022_v14, %s1183_s12  ;;  %v320_v8 = vsel %vm312_vm0, 0.0, %v303_v4  ;;  %v328_v9 = vsel %vm312_vm0, %v303_v4, 0.0  ;;  %941 = vmatpush.msra.mxu3 %v643_v7 }
  0x32   : > { %v1107_v12 = vpack.i.bf16 %v320_v8, %v1334_v20  ;;  %v397_v14 = vrot.slane %v320_v8, 2  ;;  %v398_v15 = vrot.slane %v328_v9, 2  ;;  %673 = vmatpush.msra.mxu0 %v642_v10  ;;  %v394_v16 = vrot.slane %v320_v8, 1  ;;  %940 = vmatpush.msra.mxu2 %v643_v7 }
  0x33   : > { %v395_v17 = vrot.slane %v328_v9, 1  ;;  %943 = vmatpush.msra.mxu3 %v642_v10  ;;  %v1102_v18 = vpack.i.bf16 %v320_v8, %v1265_v30  ;;  %923 = vmatmul.msk.f32.gmra.mxu1 %vm568_vm3, %v379_v51 }
  0x34   : > { %942 = vmatpush.msra.mxu2 %v642_v10 }
  0x35   : > { %v396_v22 = vsel %vm344_vm1, %v394_v16, %v395_v17 }
  0x36   : > { %1048 = vrot.lane.b32.xlu1 %v1027_v19, %s1182_s11  ;;  %v399_v19 = vsel %vm368_vm2, %v397_v14, %v398_v15  ;;  %v1112_v23 = vpack.i.bf16 %v396_v22, %v1289_v50  ;;  %v1117_v25 = vpack.i.bf16 %v396_v22, %v1352_v37  ;;  %v641_v50 = vld [vmem:[#allocation2 + $0x50] sm:$0xff]  ;;  %v631_v37 = vld [vmem:[#allocation2] sm:$0xff] }
  0x37   : > { %v1122_v24 = vpack.i.bf16 %v399_v19, %v379_v51  ;;  %674 = vmatpush.msra.mxu0 %v641_v50  ;;  %945 = vmatpush.msra.mxu3 %v641_v50 }
  0x38   : > { %1033 = vrot.lane.b32.xlu0 %v1002_v59, %s1179_s8  ;;  %v1380_v59 = vsel %vm368_vm2, %v389_v52, %v390_v54  ;;  %944 = vmatpush.msra.mxu2 %v641_v50 }
  0x39   : > { %1053 = vrot.lane.b32.xlu2 %v1052_v40, %s1184_s13  ;;  %v1092_v62 = vpack.i.bf16 %v1380_v59, %v1298_v55  ;;  %v1097_v11 = vpack.i.bf16 %v1380_v59, %v1349_v36  ;;  %v632_v36 = vld [vmem:[#allocation2 + $0x8] sm:$0xff] }
  0x3b   : > { %924 = vmatmul.msk.f32.gmra.mxu1 %vm568_vm3, %v1298_v55  ;;  %v640_v55 = vld [vmem:[#allocation2 + $0x48] sm:$0xff] }
  0x3c   : > { %675 = vmatpush.msra.mxu0 %v640_v55  ;;  %947 = vmatpush.msra.mxu3 %v640_v55 }
  0x3d   : > { %946 = vmatpush.msra.mxu2 %v640_v55 }
  0x3e   : > { %1063 = vrot.lane.b32.xlu1 %v1062_v41, %s1185_s14  ;;  %676 = vmatpush.msra.mxu0 %v639_v28 }
  0x3f   : > { %949 = vmatpush.msra.mxu3 %v639_v28  ;;  %948 = vmatpush.msra.mxu2 %v639_v28 }
  0x40   : > { %1058 = vrot.lane.b32.xlu0 %v1057_v43, %s1181_s10 }
  0x41   : > { %1068 = vrot.lane.b32.xlu2 %v1067_v48, %s1180_s9 }
  0x43   : > { %925 = vmatmul.msk.f32.gmra.mxu1 %vm568_vm3, %v1322_v13  ;;  %v636_v13 = vld [vmem:[#allocation2 + $0x28] sm:$0xff] }
  0x46   : > { %1078 = vrot.lane.b32.xlu1 %v1077_v49, %s1179_s8 }
  0x48   : > { %1073 = vrot.lane.b32.xlu0 %v1072_v3, %s1183_s12 }
  0x49   : > { %1083 = vrot.lane.b32.xlu2 %v1082_v61, %s1182_s11 }
  0x4b   : > { %926 = vmatmul.msk.f32.gmra.mxu1 %vm568_vm3, %v1356_v39 }
  0x4e   : > { %1093 = vrot.lane.b32.xlu1 %v1092_v62, %s1184_s13 }
  0x50   : > { %1088 = vrot.lane.b32.xlu0 %v1087_v6, %s1180_s9 }
  0x51   : > { %1098 = vrot.lane.b32.xlu2 %v1097_v11, %s1183_s12 }
  0x53   : > { %927 = vmatmul.msk.f32.gmra.mxu1 %vm568_vm3, %v1380_v59 }
  0x56   : > { %1108 = vrot.lane.b32.xlu1 %v1107_v12, %s1179_s8 }
  0x58   : > { %1103 = vrot.lane.b32.xlu0 %v1102_v18, %s1181_s10 }
  0x59   : > { %1113 = vrot.lane.b32.xlu2 %v1112_v23, %s1185_s14 }
  0x5b   : > { %928 = vmatmul.msk.f32.gmra.mxu1 %vm568_vm3, %v399_v19 }
  0x5e   : > { %1123 = vrot.lane.b32.xlu1 %v1122_v24, %s1184_s13 }
  0x60   : > { %1118 = vrot.lane.b32.xlu0 %v1117_v25, %s1182_s11 }
  0x61   : > { %1128 = vrot.lane.b32.xlu2 %v1127_v26, %s1181_s10 }
  0x66   : > { %558 = vrot.lane.b32.xlu1 %v1259_v27, %s1185_s14  ;;  %v638_v27 = vld [vmem:[#allocation2 + $0x38] sm:$0xff] }
  0x67   : > { %677 = vmatpush.msra.mxu0 %v638_v27  ;;  %951 = vmatpush.msra.mxu3 %v638_v27 }
  0x68   : > { %548 = vrot.lane.b32.xlu0 %v1283_v47, %s1185_s14  ;;  %v637_v47 = vld [vmem:[#allocation2 + $0x30] sm:$0xff]  ;;  %950 = vmatpush.msra.mxu2 %v638_v27 }
  0x69   : > { %678 = vmatpush.msra.mxu0 %v637_v47  ;;  %953 = vmatpush.msra.mxu3 %v637_v47 }
  0x6a   : > { %952 = vmatpush.msra.mxu2 %v637_v47 }
  0x6b   : > { %679 = vmatpush.msra.mxu0 %v636_v13  ;;  %955 = vmatpush.msra.mxu3 %v636_v13 }
  0x6c   : > { %954 = vmatpush.msra.mxu2 %v636_v13 }
  0x6d   : > { %680 = vmatpush.msra.mxu0 %v635_v31  ;;  %957 = vmatpush.msra.mxu3 %v635_v31 }
  0x6e   : > { %956 = vmatpush.msra.mxu2 %v635_v31 }
  0x6f   : > { %681 = vmatpush.msra.mxu0 %v634_v33  ;;  %959 = vmatpush.msra.mxu3 %v634_v33 }
  0x70   : > { %958 = vmatpush.msra.mxu2 %v634_v33 }
  0x71   : > { %682 = vmatpush.msra.mxu0 %v633_v35  ;;  %961 = vmatpush.msra.mxu3 %v633_v35 }
  0x72   : > { %960 = vmatpush.msra.mxu2 %v633_v35 }
  0x73   : > { %683 = vmatpush.msra.mxu0 %v632_v36  ;;  %963 = vmatpush.msra.mxu3 %v632_v36 }
  0x74   : > { %962 = vmatpush.msra.mxu2 %v632_v36 }
  0x75   : > { %684 = vmatpush.msra.mxu0 %v631_v37  ;;  %965 = vmatpush.msra.mxu3 %v631_v37 }
  0x76   : > { %964 = vmatpush.msra.mxu2 %v631_v37 }
  0x78   : > { %966 = vmatpush.msrb.mxu2 %v1386_v1 }
  0x7a   : > { %967 = vmatpush.msrb.mxu2 %v1389_v5 }
  0x7b   : > { %v1004_v34 = vpop.permute.xlu2 %1003 }
  0x7c   : > { %v1006_v7 = vunpack.i.h.bf16 %v1004_v34  ;;  %v1005_v8 = vunpack.i.l.bf16 %v1004_v34 }
  0x83   : > { %v1024_v38 = vpop.permute.xlu2 %1023 }
  0x84   : > { %v1026_v61 = vunpack.i.h.bf16 %v1024_v38  ;;  %v1025_v62 = vunpack.i.l.bf16 %v1024_v38 }
  0x8b   : > { %v1044_v41 = vpop.permute.xlu2 %1043 }
  0x8c   : > { %v1046_v23 = vunpack.i.h.bf16 %v1044_v41  ;;  %v1045_v24 = vunpack.i.l.bf16 %v1044_v41 }
  0x90   : > { %v999_v39 = vpop.permute.xlu1 %998 }
  0x91   : > { %v1001_v52 = vunpack.i.h.bf16 %v999_v39  ;;  %v1000_v54 = vunpack.i.l.bf16 %v999_v39 }
  0x92   : > { %v1009_v40 = vpop.permute.xlu0 %1008 }
  0x93   : > { %v1011_v43 = vunpack.i.h.bf16 %v1009_v40  ;;  %v1010_v44 = vunpack.i.l.bf16 %v1009_v40  ;;  %v1054_v63 = vpop.permute.xlu2 %1053 }
  0x94   : > { %v1056_v36 = vunpack.i.h.bf16 %v1054_v63  ;;  %v1055_v37 = vunpack.i.l.bf16 %v1054_v63 }
  0x95   : > { %v569_v58 = vsel %vm568_vm3, 0.0, %v1011_v43  ;;  %v573_v3 = vsel %vm568_vm3, %v1269_v32, %v1010_v44 }
  0x98   : > { %v1019_v42 = vpop.permute.xlu1 %1018 }
  0x99   : > { %v1021_v46 = vunpack.i.h.bf16 %v1019_v42  ;;  %v1020_v48 = vunpack.i.l.bf16 %v1019_v42 }
  0x9a   : > { %v1014_v45 = vpop.permute.xlu0 %1013 }
  0x9b   : > { %v1016_v49 = vunpack.i.h.bf16 %v1014_v45  ;;  %v1015_v51 = vunpack.i.l.bf16 %v1014_v45  ;;  %v1069_v22 = vpop.permute.xlu2 %1068 }
  0x9d   : > { %v578_v59 = vsel %vm577_vm4, %v569_v58, %v1016_v49  ;;  %v582_v60 = vsel %vm577_vm4, %v573_v3, %v1015_v51 }
  0x9e   : > { %v587_v0 = vsel %vm586_vm5, %v578_v59, %v1001_v52  ;;  %v591_v4 = vsel %vm586_vm5, %v582_v60, %v1000_v54  ;;  %v1070_v59 = vunpack.i.l.bf16 %v1069_v22  ;;  %v1071_v60 = vunpack.i.h.bf16 %v1069_v22 }
  0x9f   : > { %v596_v2 = vsel %vm595_vm6, %v587_v0, %v1021_v46  ;;  %v600_v5 = vsel %vm595_vm6, %v591_v4, %v1020_v48 }
  0xa0   : > { %v1039_v1 = vpop.permute.xlu1 %1038  ;;  %v605_v6 = vsel %vm604_vm7, %v596_v2, %v1026_v61  ;;  %v609_v32 = vsel %vm604_vm7, %v600_v5, %v1025_v62  ;;  %v572_v0 = vsel %vm568_vm3, %v1334_v20, %v1070_v59 }
  0xa1   : > { %v614_v12 = vsel %vm613_vm8, %v605_v6, %v1006_v7  ;;  %v618_v14 = vsel %vm613_vm8, %v609_v32, %v1005_v8  ;;  %v1041_v17 = vunpack.i.h.bf16 %v1039_v1  ;;  %v1040_v18 = vunpack.i.l.bf16 %v1039_v1 }
  0xa2   : > { %v1029_v9 = vpop.permute.xlu0 %1028  ;;  %v575_v1 = vsel %vm568_vm3, %v1304_v57, %v1071_v60 }
  0xa3   : > { %v1031_v10 = vunpack.i.h.bf16 %v1029_v9  ;;  %v1030_v11 = vunpack.i.l.bf16 %v1029_v9  ;;  %v570_v25 = vsel %vm568_vm3, %v1262_v29, %v1041_v17  ;;  %v574_v26 = vsel %vm568_vm3, %v1265_v30, %v1040_v18  ;;  %v1084_v38 = vpop.permute.xlu2 %1083 }
  0xa4   : > { %v579_v27 = vsel %vm577_vm4, %v570_v25, %v1046_v23  ;;  %v583_v47 = vsel %vm577_vm4, %v574_v26, %v1045_v24  ;;  %v1085_v7 = vunpack.i.l.bf16 %v1084_v38  ;;  %v1086_v9 = vunpack.i.h.bf16 %v1084_v38 }
  0xa5   : > { %v623_v15 = vsel %vm622_vm9, %v614_v12, %v1031_v10  ;;  %v627_v16 = vsel %vm622_vm9, %v618_v14, %v1030_v11  ;;  %v727_v59 = vpop.f32.mrf.mxu1 }
  0xa6   : > { %685 = vmatmul.f32.vlgmr.msra.gmra.mxu0 %v623_v15  ;;  %697 = vmatmul.f32.vlgmr.msra.gmra.mxu3 %v627_v16 }
  0xa8   : > { %v1049_v19 = vpop.permute.xlu1 %1048 }
  0xa9   : > { %v1051_v13 = vunpack.i.h.bf16 %v1049_v19  ;;  %v1050_v31 = vunpack.i.l.bf16 %v1049_v19 }
  0xaa   : > { %v1034_v50 = vpop.permute.xlu0 %1033 }
  0xab   : > { %v1036_v55 = vunpack.i.h.bf16 %v1034_v50  ;;  %v1035_v28 = vunpack.i.l.bf16 %v1034_v50  ;;  %v1099_v58 = vpop.permute.xlu2 %1098 }
  0xad   : > { %v588_v33 = vsel %vm586_vm5, %v579_v27, %v1036_v55  ;;  %v592_v34 = vsel %vm586_vm5, %v583_v47, %v1035_v28  ;;  %v1101_v55 = vunpack.i.h.bf16 %v1099_v58 }
  0xae   : > { %v597_v29 = vsel %vm595_vm6, %v588_v33, %v1051_v13  ;;  %v601_v30 = vsel %vm595_vm6, %v592_v34, %v1050_v31  ;;  %v1100_v31 = vunpack.i.l.bf16 %v1099_v58 }
  0xaf   : > { %v606_v44 = vsel %vm604_vm7, %v597_v29, %v1056_v36  ;;  %v610_v45 = vsel %vm604_vm7, %v601_v30, %v1055_v37 }
  0xb0   : > { %v1064_v35 = vpop.permute.xlu1 %1063  ;;  %v730_v60 = vpop.f32.mrf.mxu1 }
  0xb1   : > { %v1066_v39 = vunpack.i.h.bf16 %v1064_v35  ;;  %v1065_v40 = vunpack.i.l.bf16 %v1064_v35 }
  0xb2   : > { %v1059_v41 = vpop.permute.xlu0 %1058 }
  0xb3   : > { %v1061_v42 = vunpack.i.h.bf16 %v1059_v41  ;;  %v1060_v43 = vunpack.i.l.bf16 %v1059_v41  ;;  %v1114_v32 = vpop.permute.xlu2 %1113 }
  0xb4   : > { %v1116_v16 = vunpack.i.h.bf16 %v1114_v32  ;;  %v1115_v57 = vunpack.i.l.bf16 %v1114_v32 }
  0xb5   : > { %v615_v46 = vsel %vm613_vm8, %v606_v44, %v1061_v42  ;;  %v619_v48 = vsel %vm613_vm8, %v610_v45, %v1060_v43 }
  0xb6   : > { %v624_v51 = vsel %vm622_vm9, %v615_v46, %v1066_v39  ;;  %v628_v52 = vsel %vm622_vm9, %v619_v48, %v1065_v40 }
  0xb7   : > { %688 = vmatmul.f32.gmra.mxu0 %v624_v51  ;;  %700 = vmatmul.f32.gmra.mxu3 %v628_v52 }
  0xb8   : > { %v1079_v49 = vpop.permute.xlu1 %1078 }
  0xb9   : > { %v1080_v4 = vunpack.i.l.bf16 %v1079_v49  ;;  %v1081_v2 = vunpack.i.h.bf16 %v1079_v49 }
  0xba   : > { %v1074_v54 = vpop.permute.xlu0 %1073 }
  0xbb   : > { %v1075_v61 = vunpack.i.l.bf16 %v1074_v54  ;;  %v1076_v62 = vunpack.i.h.bf16 %v1074_v54  ;;  %v1129_v33 = vpop.permute.xlu2 %1128 }
  0xbc   : > { %v1131_v38 = vunpack.i.h.bf16 %v1129_v33  ;;  %v1130_v45 = vunpack.i.l.bf16 %v1129_v33 }
  0xbd   : > { %v581_v5 = vsel %vm577_vm4, %v572_v0, %v1075_v61  ;;  %v584_v6 = vsel %vm577_vm4, %v575_v1, %v1076_v62  ;;  %v733_v61 = vpop.f32.mrf.mxu1 }
  0xbe   : > { %v590_v10 = vsel %vm586_vm5, %v581_v5, %v1080_v4  ;;  %v593_v11 = vsel %vm586_vm5, %v584_v6, %v1081_v2 }
  0xbf   : > { %v599_v20 = vsel %vm595_vm6, %v590_v10, %v1085_v7  ;;  %v602_v17 = vsel %vm595_vm6, %v593_v11, %v1086_v9 }
  0xc0   : > { %v1094_v3 = vpop.permute.xlu1 %1093 }
  0xc1   : > { %v1096_v12 = vunpack.i.h.bf16 %v1094_v3  ;;  %v1095_v14 = vunpack.i.l.bf16 %v1094_v3 }
  0xc2   : > { %v1089_v63 = vpop.permute.xlu0 %1088 }
  0xc3   : > { %v1091_v18 = vunpack.i.h.bf16 %v1089_v63  ;;  %v1090_v23 = vunpack.i.l.bf16 %v1089_v63  ;;  %v608_v24 = vsel %vm604_vm7, %v599_v20, %v1095_v14  ;;  %v611_v25 = vsel %vm604_vm7, %v602_v17, %v1096_v12  ;;  %v1132_v63 = vld [vmem:[%s1550_s3] ss:$0 sm:$0xff] }
  0xc5   : > { %v576_v13 = vsel %vm568_vm3, %v1337_v21, %v1091_v18  ;;  %v571_v34 = vsel %vm568_vm3, %v1301_v56, %v1090_v23  ;;  %v736_v62 = vpop.f32.mrf.mxu1 }
  0xc6   : > { %v585_v37 = vsel %vm577_vm4, %v576_v13, %v1101_v55  ;;  %v580_v39 = vsel %vm577_vm4, %v571_v34, %v1100_v31 }
  0xc8   : > { %v1109_v8 = vpop.permute.xlu1 %1108 }
  0xc9   : > { %v1111_v35 = vunpack.i.h.bf16 %v1109_v8  ;;  %v1110_v36 = vunpack.i.l.bf16 %v1109_v8 }
  0xca   : > { %v1104_v15 = vpop.permute.xlu0 %1103 }
  0xcb   : > { %v1106_v19 = vunpack.i.h.bf16 %v1104_v15  ;;  %v1105_v22 = vunpack.i.l.bf16 %v1104_v15  ;;  %v594_v21 = vsel %vm586_vm5, %v585_v37, %v1111_v35  ;;  %v589_v43 = vsel %vm586_vm5, %v580_v39, %v1110_v36 }
  0xcd   : > { %v617_v26 = vsel %vm613_vm8, %v608_v24, %v1105_v22  ;;  %v620_v50 = vsel %vm613_vm8, %v611_v25, %v1106_v19  ;;  %v739_v2 = vpop.f32.mrf.mxu1 }
  0xce   : > { %v626_v27 = vsel %vm622_vm9, %v617_v26, %v1115_v57  ;;  %v629_v47 = vsel %vm622_vm9, %v620_v50, %v1116_v16 }
  0xcf   : > { %694 = vmatmul.f32.vlgmr.msra.gmra.mxu2 %v626_v27  ;;  %703 = vmatmul.f32.gmra.mxu3 %v629_v47 }
  0xd0   : > { %v1124_v28 = vpop.permute.xlu1 %1123 }
  0xd1   : > { %v1126_v29 = vunpack.i.h.bf16 %v1124_v28  ;;  %v1125_v40 = vunpack.i.l.bf16 %v1124_v28 }
  0xd2   : > { %v1119_v30 = vpop.permute.xlu0 %1118 }
  0xd3   : > { %v1121_v41 = vunpack.i.h.bf16 %v1119_v30  ;;  %v1120_v42 = vunpack.i.l.bf16 %v1119_v30 }
  0xd5   : > { %v598_v44 = vsel %vm595_vm6, %v589_v43, %v1120_v42  ;;  %v603_v56 = vsel %vm595_vm6, %v594_v21, %v1121_v41  ;;  %v742_v10 = vpop.f32.mrf.mxu1 }
  0xd6   : > { %v612_v48 = vsel %vm604_vm7, %v603_v56, %v1126_v29  ;;  %v607_v51 = vsel %vm604_vm7, %v598_v44, %v1125_v40 }
  0xd7   : > { %v621_v49 = vsel %vm613_vm8, %v612_v48, %v1131_v38  ;;  %929 = vmatmul.msk.f32.vlgmr.msrb.gmra.mxu2 %vm568_vm3, %v1293_v53  ;;  %v616_v58 = vsel %vm613_vm8, %v607_v51, %v1130_v45 }
  0xd8   : > { %v559_v46 = vpop.permute.xlu1 %558 }
  0xd9   : > { %v630_v52 = vsel %vm622_vm9, %v621_v49, %v559_v46 }
  0xda   : > { %706 = vmatmul.f32.gmra.mxu3 %v630_v52  ;;  %v549_v54 = vpop.permute.xlu0 %548 }
  0xdb   : > { %v625_v3 = vsel %vm622_vm9, %v616_v58, %v549_v54 }
  0xdc   : > { %691 = vmatmul.f32.gmra.mxu0 %v625_v3 }
  0xdd   : > { %v745_v14 = vpop.f32.mrf.mxu1 }
 0x123   : > { %v686_v53 = vpop.f32.mrf.mxu0 }
 0x124   : > { %v687_v0 = vadd.f32 %v1132_v63, %v686_v53 }
 0x126   : > { %v728_v4 = vadd.f32 %v727_v59, %v687_v0 }
 0x128   : > { %751 = vst.msk [vmem:[%s1505_s20] sm:$0xff] %vm568_vm3, %v728_v4  ;;  %v780_v23 = vmul.f32 %v728_v4, %v728_v4  ;;  %v759_v26 = vsel %vm568_vm3, %v728_v4, 0.0 }
 0x129   : > { %v698_v1 = vpop.f32.mrf.mxu3 }
 0x12a   : > { %v699_v5 = vadd.f32 %v1132_v63, %v698_v1  ;;  %v788_v31 = vsel %vm568_vm3, %v780_v23, 0.0 }
 0x12c   : > { %v740_v6 = vadd.f32 %v739_v2, %v699_v5 }
 0x12e   : > { %755 = vst.msk [vmem:[%s1505_s20 + $0x20] sm:$0xff] %vm568_vm3, %v740_v6  ;;  %v784_v30 = vmul.f32 %v740_v6, %v740_v6  ;;  %v766_v42 = vsel %vm568_vm3, %v740_v6, 0.0 }
 0x130   : > { %v795_v45 = vsel %vm568_vm3, %v784_v30, 0.0 }
 0x134   : > { %v689_v32 = vpop.f32.mrf.mxu0 }
 0x135   : > { %v690_v7 = vadd.f32 %v1132_v63, %v689_v32 }
 0x137   : > { %v731_v8 = vadd.f32 %v730_v60, %v690_v7 }
 0x139   : > { %752 = vst.msk [vmem:[%s1505_s20 + $0x8] sm:$0xff] %vm568_vm3, %v731_v8  ;;  %v781_v19 = vmul.f32 %v731_v8, %v731_v8  ;;  %v760_v24 = vsel %vm568_vm3, %v731_v8, 0.0 }
 0x13a   : > { %v701_v9 = vpop.f32.mrf.mxu3  ;;  %v761_v47 = vadd.f32 %v760_v24, %v759_v26 }
 0x13b   : > { %v702_v11 = vadd.f32 %v1132_v63, %v701_v9  ;;  %v789_v50 = vsel %vm568_vm3, %v781_v19, 0.0 }
 0x13c   : > { %v790_v36 = vadd.f32 %v789_v50, %v788_v31 }
 0x13d   : > { %v743_v12 = vadd.f32 %v742_v10, %v702_v11 }
 0x13f   : > { %756 = vst.msk [vmem:[%s1505_s20 + $0x28] sm:$0xff] %vm568_vm3, %v743_v12  ;;  %v785_v21 = vmul.f32 %v743_v12, %v743_v12  ;;  %v768_v46 = vsel %vm568_vm3, %v743_v12, 0.0 }
 0x141   : > { %v797_v52 = vsel %vm568_vm3, %v785_v21, 0.0 }
 0x152   : > { %v695_v20 = vpop.f32.mrf.mxu2  ;;  %v704_v15 = vpop.f32.mrf.mxu3 }
 0x153   : > { %v696_v16 = vadd.f32 %v1132_v63, %v695_v20  ;;  %v705_v57 = vadd.f32 %v1132_v63, %v704_v15 }
 0x155   : > { %v737_v17 = vadd.f32 %v736_v62, %v696_v16  ;;  %v746_v18 = vadd.f32 %v745_v14, %v705_v57 }
 0x157   : > { %754 = vst.msk [vmem:[%s1505_s20 + $0x18] sm:$0xff] %vm568_vm3, %v737_v17  ;;  %v783_v33 = vmul.f32 %v737_v17, %v737_v17  ;;  %v764_v38 = vsel %vm568_vm3, %v737_v17, 0.0  ;;  %v786_v48 = vmul.f32 %v746_v18, %v746_v18  ;;  %v770_v54 = vsel %vm568_vm3, %v746_v18, 0.0 }
 0x158   : > { %757 = vst.msk [vmem:[%s1505_s20 + $0x30] sm:$0xff] %vm568_vm3, %v746_v18 }
 0x159   : > { %v692_v22 = vpop.f32.mrf.mxu0  ;;  %v793_v43 = vsel %vm568_vm3, %v783_v33, 0.0  ;;  %v799_v60 = vsel %vm568_vm3, %v786_v48, 0.0 }
 0x15a   : > { %v693_v25 = vadd.f32 %v1132_v63, %v692_v22  ;;  %v748_v27 = vpop.f32.mrf.mxu2 }
 0x15c   : > { %v734_v55 = vadd.f32 %v733_v61, %v693_v25 }
 0x15d   : > { %v707_v28 = vpop.f32.mrf.mxu3 }
 0x15e   : > { %v708_v13 = vadd.f32 %v1132_v63, %v707_v28  ;;  %753 = vst.msk [vmem:[%s1505_s20 + $0x10] sm:$0xff] %vm568_vm3, %v734_v55  ;;  %v762_v34 = vsel %vm568_vm3, %v734_v55, 0.0  ;;  %v782_v35 = vmul.f32 %v734_v55, %v734_v55 }
 0x15f   : > { %v763_v37 = vadd.f32 %v762_v34, %v761_v47 }
 0x160   : > { %v749_v29 = vadd.f32 %v748_v27, %v708_v13  ;;  %v791_v39 = vsel %vm568_vm3, %v782_v35, 0.0 }
 0x161   : > { %v765_v40 = vadd.f32 %v764_v38, %v763_v37  ;;  %v792_v41 = vadd.f32 %v791_v39, %v790_v36 }
 0x162   : > { %758 = vst.msk [vmem:[%s1505_s20 + $0x38] sm:$0xff] %vm568_vm3, %v749_v29  ;;  %v787_v58 = vmul.f32 %v749_v29, %v749_v29  ;;  %v772_v61 = vsel %vm568_vm3, %v749_v29, 0.0 }
 0x163   : > { %v794_v44 = vadd.f32 %v793_v43, %v792_v41  ;;  %v767_v56 = vadd.f32 %v766_v42, %v765_v40 }
 0x164   : > { %v801_v53 = vsel %vm568_vm3, %v787_v58, 0.0 }
 0x165   : > { %v769_v49 = vadd.f32 %v768_v46, %v767_v56  ;;  %v796_v51 = vadd.f32 %v795_v45, %v794_v44 }
 0x167   : > { %v771_v3 = vadd.f32 %v770_v54, %v769_v49  ;;  %v798_v59 = vadd.f32 %v797_v52, %v796_v51 }
 0x169   : > { %v773_v62 = vadd.f32 %v772_v61, %v771_v3  ;;  %v800_v63 = vadd.f32 %v799_v60, %v798_v59 }
 0x16b   : > { %v774_v0 = vrot.slane %v773_v62, 4  ;;  %v802_v4 = vadd.f32 %v801_v53, %v800_v63 }
 0x16d   : > { %v775_v1 = vadd.f32 %v774_v0, %v773_v62  ;;  %v803_v2 = vrot.slane %v802_v4, 4 }
 0x16f   : > { %v776_v5 = vrot.slane %v775_v1, 2  ;;  %v804_v6 = vadd.f32 %v803_v2, %v802_v4 }
 0x171   : > { %v777_v32 = vadd.f32 %v776_v5, %v775_v1  ;;  %v805_v7 = vrot.slane %v804_v6, 2 }
 0x173   : > { %v778_v8 = vrot.slane %v777_v32, 1  ;;  %v806_v9 = vadd.f32 %v805_v7, %v804_v6 }
 0x175   : > { %v807_v10 = vrot.slane %v806_v9, 1  ;;  %v779_v11 = vadd.f32 %v778_v8, %v777_v32 }
 0x177   : > { %v808_v12 = vadd.f32 %v807_v10, %v806_v9 }
 0x179   : > { %v809_v14 = vsel %vm312_vm0, %v779_v11, %v808_v12 }
 0x17a   : > { %811 = vst.msk [vmem:[%s252_s25] sm:$0x3] %vm810_vm10, %v809_v14 }
 0x17b PF: > { %s17_s18 = sadd.s32 1, %s1173_s18  }
 0x17c   : > { %p14_p7 = scmp.ge.s32.totalorder %s17_s18, 4  }
 0x17e   :  { %16 = sbr.rel (!%p14_p7) target bundleno = 1 (0x1), region = 83 }
 0x183   :  { %847 = vsyncpa [#allocation3], 1 }
 0x184   :  { %849 = vsyncpa [#allocation3 + $0x1], 1 }

</bundles_post_ra>
